<compile_context>
chip_gen: v6e
topology: v6e:2x2x1
jax: 0.10.0
libtpu: 0.0.40
codegen_flags: <defaults>
</compile_context>

<pallas_src>
import math

import jax
import jax.numpy as jnp
from jax import lax
from jax.experimental import pallas as pl
from jax.experimental.pallas import tpu as pltpu

# ----------------------------- small config ---------------------------------
BATCH = 2
SEQ = 8
VOCAB = 100
D_MODEL = 32        # stands in for 768
N_HEAD = 2
D_HEAD = 16
ND = N_HEAD * D_HEAD
D_INNER = 64        # stands in for 3072
N_LAYER = 2         # stands in for 12
N_LABELS = 8        # stands in for 64
LN_EPS = 1e-12
SCALE = 1.0 / math.sqrt(D_HEAD)

# Batch folding: one chunk holds B_PER_CHUNK full sequences in a single block.
N_CHUNKS = 1                      # v7x: set to 2 (one chunk per TensorCore)
B_PER_CHUNK = BATCH // N_CHUNKS
ROWS = B_PER_CHUNK * SEQ          # rows of the fused activation block

# Relative-position axis padded to a full 128-lane tile -> lane-dense bd matmul and
# an (8,128)-aligned operand for the strided roll.
POS_PAD = max(128, ((2 * SEQ + 127) // 128) * 128)

# contract the last dim of both operands (q @ k^T without an explicit transpose)
_DN_TT = (((1,), (1,)), ((), ()))

# rows of the packed per-layer "small params" block
SMALL_ROWS = 8


def _layernorm(x, g, b):
    mu = jnp.mean(x, axis=-1, keepdims=True)
    var = jnp.mean(jnp.square(x - mu), axis=-1, keepdims=True)
    return (x - mu) * lax.rsqrt(var + LN_EPS) * g + b


# ------------------------------ fused kernel ---------------------------------
def _xlnet_fused_kernel(h0_ref, mask_ref, kr_ref,
                        qkv_w_ref, o_w_ref, ff1_w_ref, ff2_w_ref,
                        small_ref, clf_w_ref, clf_b_ref,
                        logits_ref,
                        h_scr):
    """One (batch-chunk, layer) step of the XLNet stack, fully resident in VMEM."""
    layer = pl.program_id(1)

    # Layer 0: load this chunk's embedded tokens into the resident scratch.
    @pl.when(layer == 0)
    def _init():
        h_scr[...] = h0_ref[...]

    # ---- packed per-layer 1-row params (one DMA'd [8, D_INNER] block) ----------
    rwb   = small_ref[0:1, 0:ND]          # r_w_bias
    rrb   = small_ref[1:2, 0:ND]          # r_r_bias
    ln1_g = small_ref[2:3, 0:D_MODEL]
    ln1_b = small_ref[3:4, 0:D_MODEL]
    ff1_b = small_ref[4:5, 0:D_INNER]
    ff2_b = small_ref[5:6, 0:D_MODEL]
    ln2_g = small_ref[6:7, 0:D_MODEL]
    ln2_b = small_ref[7:8, 0:D_MODEL]

    h = h_scr[...]                                     # [ROWS, D] f32 residual stream
    h_bf = h.astype(jnp.bfloat16)

    # ---- relative attention ----------------------------------------------------
    # fused QKV projection for the whole chunk (single MXU matmul)
    qkv = jnp.dot(h_bf, qkv_w_ref[...], preferred_element_type=jnp.float32)  # [ROWS, 3nd]
    q = qkv[:, 0 * ND:1 * ND]
    k = qkv[:, 1 * ND:2 * ND]
    v = qkv[:, 2 * ND:3 * ND]

    # fold the 1/sqrt(d) scale into the two query streams once (hoisted out of loops)
    q_ac = ((q + rwb) * SCALE).astype(jnp.bfloat16)    # content stream  (q + r_w_bias)
    q_bd = ((q + rrb) * SCALE).astype(jnp.bfloat16)    # position stream (q + r_r_bias)
    k_bf = k.astype(jnp.bfloat16)
    v_bf = v.astype(jnp.bfloat16)
    kr = kr_ref[...]                                   # [POS_PAD, nd] bf16 (precomputed)
    o_w = o_w_ref[...]                                 # [nd, D] bf16

    attn_rows = []
    for b in range(B_PER_CHUNK):                       # static unroll over sequences
        rs = slice(b * SEQ, (b + 1) * SEQ)
        # padding mask broadcast hoisted out of the head loop (no re-emitted bcast)
        mask_b = jnp.broadcast_to(mask_ref[b:b + 1, :], (SEQ, SEQ))
        attn_b = jnp.zeros((SEQ, D_MODEL), jnp.float32)

        for hh in range(N_HEAD):                       # static unroll over heads
            cs = slice(hh * D_HEAD, (hh + 1) * D_HEAD)
            qa, qb = q_ac[rs, cs], q_bd[rs, cs]        # [S, d]
            kk, vv = k_bf[rs, cs], v_bf[rs, cs]        # [S, d]
            krh = kr[:, cs]                            # [POS_PAD, d]

            ac = lax.dot_general(qa, kk, _DN_TT,
                                 preferred_element_type=jnp.float32)          # [S, S]
            bd_full = lax.dot_general(qb, krh, _DN_TT,
                                      preferred_element_type=jnp.float32)      # [S, POS_PAD]

            # Transformer-XL rel_shift: shifted[i, j] = bd_full[i, S - i + j]
            # done as one strided lane roll (XLU) on the (8,128)-aligned slab.
            # TODO(synk): assumes qlen == klen and no memory (mlen = 0), as in the ref.
            bd = pltpu.roll(bd_full, POS_PAD - SEQ, 1,
                            stride=1, stride_axis=0)[:, :SEQ]                  # [S, S]

            score = ac + bd + mask_b                   # scale already folded into q
            score = score - jnp.max(score, axis=-1, keepdims=True)
            p = jnp.exp(score)
            p = p * pl.reciprocal(jnp.sum(p, axis=-1, keepdims=True), approx=True)

            head = jnp.dot(p.astype(jnp.bfloat16), vv,
                           preferred_element_type=jnp.float32)                 # [S, d]
            # per-head output projection accumulated in registers (no attn scratch)
            attn_b = attn_b + jnp.dot(head.astype(jnp.bfloat16), o_w[cs, :],
                                      preferred_element_type=jnp.float32)      # [S, D]
        attn_rows.append(attn_b)

    attn_out = attn_rows[0] if B_PER_CHUNK == 1 else jnp.concatenate(attn_rows, axis=0)
    h1 = _layernorm(h + attn_out, ln1_g, ln1_b)

    # ---- position-wise FFN (whole chunk at once) --------------------------------
    ff = jnp.dot(h1.astype(jnp.bfloat16), ff1_w_ref[...],
                 preferred_element_type=jnp.float32) + ff1_b
    # TODO(synk): HF XLNet uses exact (erf) GELU; tanh approximation used here.
    ff = jax.nn.gelu(ff, approximate=True)
    ff = jnp.dot(ff.astype(jnp.bfloat16), ff2_w_ref[...],
                 preferred_element_type=jnp.float32) + ff2_b
    h2 = _layernorm(h1 + ff, ln2_g, ln2_b)

    h_scr[...] = h2                                    # carry to the next layer

    # ---- last layer: mean over seq (matches torch.mean(h, 1)) + classifier ------
    @pl.when(layer == pl.num_programs(1) - 1)
    def _classify():
        w = clf_w_ref[...]
        bcls = clf_b_ref[...]
        for b in range(B_PER_CHUNK):
            pooled = jnp.mean(h2[b * SEQ:(b + 1) * SEQ, :], axis=0, keepdims=True)  # [1, D]
            logits_ref[b:b + 1, :] = (jnp.dot(pooled, w,
                                              preferred_element_type=jnp.float32)
                                      + bcls)


# ------------------------------ JAX glue -------------------------------------
def relative_positional_encoding(qlen, klen, d_model):
    inv_freq = 1.0 / (10000.0 ** (jnp.arange(0, d_model, 2.0) / d_model))
    pos_seq = jnp.arange(klen, -qlen, -1.0)                      # length qlen + klen
    sinusoid = jnp.einsum("i,d->id", pos_seq, inv_freq)
    return jnp.concatenate([jnp.sin(sinusoid), jnp.cos(sinusoid)], axis=-1)


def xlnet_forward(params, input_ids, attention_mask=None):
    B, S = input_ids.shape
    assert (B, S) == (BATCH, SEQ)

    # word-embedding lookup (XLA gather — glue), folded batch layout [chunks, rows, D]
    h0 = params["word_emb"][input_ids].astype(jnp.float32).reshape(
        N_CHUNKS, ROWS, D_MODEL)

    if attention_mask is None:
        attention_mask = jnp.ones((B, S), jnp.float32)
    mask_add = (-1e30 * (1.0 - attention_mask.astype(jnp.float32))
                ).reshape(N_CHUNKS, B_PER_CHUNK, SEQ)

    # batch-independent relative-position projection precomputed per layer (glue),
    # padded to a full 128-lane position axis for the in-kernel strided roll.
    pos_emb = relative_positional_encoding(S, S, D_MODEL)                       # [2S, D]
    kr = jnp.einsum("pd,ldn->lpn", pos_emb, params["r_w"].astype(jnp.float32))  # [L, 2S, nd]
    kr = jnp.pad(kr, ((0, 0), (0, POS_PAD - 2 * S), (0, 0))).astype(jnp.bfloat16)

    # pack the tiny per-layer 1-row params into one [L, 8, D_INNER] block (one DMA)
    def _row(p):
        return jnp.pad(p, ((0, 0), (0, D_INNER - p.shape[-1])))[:, None, :]
    small = jnp.concatenate(
        [_row(params["r_w_bias"]), _row(params["r_r_bias"]),
         _row(params["ln1_g"]), _row(params["ln1_b"]),
         _row(params["ff1_b"]), _row(params["ff2_b"]),
         _row(params["ln2_g"]), _row(params["ln2_b"])],
        axis=1).astype(jnp.float32)                                             # [L, 8, D_INNER]

    per_layer = lambda c, l: (l, 0, 0)
    per_chunk = lambda c, l: (c, 0, 0)
    resident2 = lambda c, l: (0, 0)

    in_specs = [
        pl.BlockSpec((None, ROWS, D_MODEL), per_chunk),          # h0 (folded batch chunk)
        pl.BlockSpec((None, B_PER_CHUNK, SEQ), per_chunk),       # additive padding mask
        pl.BlockSpec((None, POS_PAD, ND), per_layer),            # kr = pos_emb @ r_w  (per layer)
        pl.BlockSpec((None, D_MODEL, 3 * ND), per_layer),        # fused qkv weights
        pl.BlockSpec((None, ND, D_MODEL), per_layer),            # output projection
        pl.BlockSpec((None, D_MODEL, D_INNER), per_layer),       # ff1 w
        pl.BlockSpec((None, D_INNER, D_MODEL), per_layer),       # ff2 w
        pl.BlockSpec((None, SMALL_ROWS, D_INNER), per_layer),    # packed small params
        pl.BlockSpec((D_MODEL, N_LABELS), resident2),            # classifier w
        pl.BlockSpec((1, N_LABELS), resident2),                  # classifier b
    ]

    logits = pl.pallas_call(
        _xlnet_fused_kernel,
        out_shape=jax.ShapeDtypeStruct((N_CHUNKS, B_PER_CHUNK, N_LABELS), jnp.float32),
        grid_spec=pltpu.PrefetchScalarGridSpec(
            num_scalar_prefetch=0,
            grid=(N_CHUNKS, N_LAYER),      # batch chunks (parallel) x layers (sequential)
            in_specs=in_specs,
            out_specs=pl.BlockSpec((None, B_PER_CHUNK, N_LABELS), per_chunk),
            scratch_shapes=[
                pltpu.VMEM((ROWS, D_MODEL), jnp.float32),        # residual stream carry
            ],
        ),
        compiler_params=pltpu.CompilerParams(
            dimension_semantics=("parallel", "arbitrary"),
            vmem_limit_bytes=32 * 1024 * 1024,
        ),
    )(h0, mask_add, kr,
      params["qkv_w"], params["o_w"], params["ff1_w"], params["ff2_w"],
      small, params["clf_w"], params["clf_b"])

    return logits.reshape(B, N_LABELS)


# ------------------------------ parameter init --------------------------------
def init_params(key):
    def nrm(k, shape, std=0.02, dtype=jnp.float32):
        return (std * jax.random.normal(k, shape, jnp.float32)).astype(dtype)

    keys = iter(jax.random.split(key, 16))
    params = {
        "word_emb": nrm(next(keys), (VOCAB, D_MODEL)),
        # per-layer weights stacked on a leading layer axis; MXU matmul operands are
        # stored as bf16, biases / LN params stay f32.
        # TODO(synk): bf16 weight storage adds quantization error vs an f32 torch model.
        "qkv_w": nrm(next(keys), (N_LAYER, D_MODEL, 3 * ND), dtype=jnp.bfloat16),
        "r_w": nrm(next(keys), (N_LAYER, D_MODEL, ND)),          # f32: used in wrapper precompute
        "o_w": nrm(next(keys), (N_LAYER, ND, D_MODEL), dtype=jnp.bfloat16),
        "r_w_bias": nrm(next(keys), (N_LAYER, ND)),
        "r_r_bias": nrm(next(keys), (N_LAYER, ND)),
        "ln1_g": jnp.ones((N_LAYER, D_MODEL), jnp.float32),
        "ln1_b": jnp.zeros((N_LAYER, D_MODEL), jnp.float32),
        "ff1_w": nrm(next(keys), (N_LAYER, D_MODEL, D_INNER), dtype=jnp.bfloat16),
        "ff1_b": jnp.zeros((N_LAYER, D_INNER), jnp.float32),
        "ff2_w": nrm(next(keys), (N_LAYER, D_INNER, D_MODEL), dtype=jnp.bfloat16),
        "ff2_b": jnp.zeros((N_LAYER, D_MODEL), jnp.float32),
        "ln2_g": jnp.ones((N_LAYER, D_MODEL), jnp.float32),
        "ln2_b": jnp.zeros((N_LAYER, D_MODEL), jnp.float32),
    }

    # classifier: torch.nn.Linear(D, L) with xavier_normal_ weight
    xavier_std = math.sqrt(2.0 / (D_MODEL + N_LABELS))
    params["clf_w"] = (xavier_std *
                       jax.random.normal(next(keys), (D_MODEL, N_LABELS))
                       ).astype(jnp.float32)
    bound = 1.0 / math.sqrt(D_MODEL)
    params["clf_b"] = jax.random.uniform(next(keys), (1, N_LABELS),
                                         minval=-bound, maxval=bound
                                         ).astype(jnp.float32)
    return params


# ---------------------------------- main --------------------------------------
if __name__ == "__main__":
    key = jax.random.PRNGKey(0)
    k_param, k_ids = jax.random.split(key)

    params = init_params(k_param)

    input_ids = jax.random.randint(k_ids, (BATCH, SEQ), 0, VOCAB, dtype=jnp.int32)
    attention_mask = jnp.array(
        [[1, 1, 1, 1, 1, 1, 1, 1],
         [1, 1, 1, 1, 1, 1, 0, 0]], dtype=jnp.float32)          # batch 1 has padding

    fwd = jax.jit(xlnet_forward)
    logits = fwd(params, input_ids, attention_mask)
    jax.block_until_ready(logits)

    assert logits.shape == (BATCH, N_LABELS), logits.shape
    assert bool(jnp.all(jnp.isfinite(logits)))
    print("KERNEL_OK")
</pallas_src>

<mosaic_0001>
module attributes {stable_mosaic.version = 11 : i64} {
  func.func @_xlnet_fused_kernel(%arg0: i32, %arg1: i32, %arg2: memref<1x16x32xf32, #tpu.memory_space<vmem>>, %arg3: memref<1x2x8xf32, #tpu.memory_space<vmem>>, %arg4: memref<1x128x32xbf16, #tpu.memory_space<vmem>>, %arg5: memref<1x32x96xbf16, #tpu.memory_space<vmem>>, %arg6: memref<1x32x32xbf16, #tpu.memory_space<vmem>>, %arg7: memref<1x32x64xbf16, #tpu.memory_space<vmem>>, %arg8: memref<1x64x32xbf16, #tpu.memory_space<vmem>>, %arg9: memref<1x8x64xf32, #tpu.memory_space<vmem>>, %arg10: memref<32x8xf32, #tpu.memory_space<vmem>>, %arg11: memref<1x8xf32, #tpu.memory_space<vmem>>, %arg12: memref<1x2x8xf32, #tpu.memory_space<vmem>>, %arg13: memref<16x32xf32, #tpu.memory_space<vmem>>) attributes {dimension_semantics = [#tpu.dimension_semantics<parallel>, #tpu.dimension_semantics<arbitrary>], iteration_bounds = array<i64: 1, 2>, scalar_prefetch = 0 : i64, scratch_operands = 1 : i64, tpu.core_type = #tpu.core_type<tc>, window_params = [{transform_indices = @transform_0, window_bounds = array<i64: 1, 16, 32>}, {transform_indices = @transform_1, window_bounds = array<i64: 1, 2, 8>}, {transform_indices = @transform_2, window_bounds = array<i64: 1, 128, 32>}, {transform_indices = @transform_3, window_bounds = array<i64: 1, 32, 96>}, {transform_indices = @transform_4, window_bounds = array<i64: 1, 32, 32>}, {transform_indices = @transform_5, window_bounds = array<i64: 1, 32, 64>}, {transform_indices = @transform_6, window_bounds = array<i64: 1, 64, 32>}, {transform_indices = @transform_7, window_bounds = array<i64: 1, 8, 64>}, {pipeline_mode = #tpu.pipeline_mode<synchronous>, transform_indices = @transform_8, window_bounds = array<i64: 32, 8>}, {pipeline_mode = #tpu.pipeline_mode<synchronous>, transform_indices = @transform_9, window_bounds = array<i64: 1, 8>}, {transform_indices = @transform_10, window_bounds = array<i64: 1, 2, 8>}]} {
    %c0_i32 = arith.constant 0 : i32
    %0 = arith.cmpi eq, %arg1, %c0_i32 : i32
    %1 = arith.extui %0 : i1 to i32
    %c0_i32_0 = arith.constant 0 : i32
    %2 = arith.cmpi ne, %1, %c0_i32_0 : i32
    scf.if %2 {
      %c0_90 = arith.constant 0 : index
      %c0_91 = arith.constant 0 : index
      %c0_92 = arith.constant 0 : index
      %237 = vector.load %arg2[%c0_90, %c0_91, %c0_92] : memref<1x16x32xf32, #tpu.memory_space<vmem>>, vector<1x16x32xf32>
      %238 = vector.shape_cast %237 : vector<1x16x32xf32> to vector<16x32xf32>
      %c0_93 = arith.constant 0 : index
      %c0_94 = arith.constant 0 : index
      %239 = vector.load %arg13[%c0_93, %c0_94] : memref<16x32xf32, #tpu.memory_space<vmem>>, vector<16x32xf32>
      tpu.vector_store %arg13[%c0_93, %c0_94], %238 {strides = array<i32>} : memref<16x32xf32, #tpu.memory_space<vmem>>, vector<16x32xf32>,
    } else {
    }
    %c0 = arith.constant 0 : index
    %c0_1 = arith.constant 0 : index
    %c0_2 = arith.constant 0 : index
    %3 = vector.load %arg9[%c0, %c0_1, %c0_2] : memref<1x8x64xf32, #tpu.memory_space<vmem>>, vector<1x1x32xf32>
    %4 = vector.shape_cast %3 : vector<1x1x32xf32> to vector<1x32xf32>
    %c0_3 = arith.constant 0 : index
    %c1 = arith.constant 1 : index
    %c0_4 = arith.constant 0 : index
    %5 = vector.load %arg9[%c0_3, %c1, %c0_4] : memref<1x8x64xf32, #tpu.memory_space<vmem>>, vector<1x1x32xf32>
    %6 = vector.shape_cast %5 : vector<1x1x32xf32> to vector<1x32xf32>
    %c0_5 = arith.constant 0 : index
    %c2 = arith.constant 2 : index
    %c0_6 = arith.constant 0 : index
    %7 = vector.load %arg9[%c0_5, %c2, %c0_6] : memref<1x8x64xf32, #tpu.memory_space<vmem>>, vector<1x1x32xf32>
    %8 = vector.shape_cast %7 : vector<1x1x32xf32> to vector<1x32xf32>
    %c0_7 = arith.constant 0 : index
    %c3 = arith.constant 3 : index
    %c0_8 = arith.constant 0 : index
    %9 = vector.load %arg9[%c0_7, %c3, %c0_8] : memref<1x8x64xf32, #tpu.memory_space<vmem>>, vector<1x1x32xf32>
    %10 = vector.shape_cast %9 : vector<1x1x32xf32> to vector<1x32xf32>
    %c0_9 = arith.constant 0 : index
    %c4 = arith.constant 4 : index
    %c0_10 = arith.constant 0 : index
    %11 = vector.load %arg9[%c0_9, %c4, %c0_10] : memref<1x8x64xf32, #tpu.memory_space<vmem>>, vector<1x1x64xf32>
    %12 = vector.shape_cast %11 : vector<1x1x64xf32> to vector<1x64xf32>
    %c0_11 = arith.constant 0 : index
    %c5 = arith.constant 5 : index
    %c0_12 = arith.constant 0 : index
    %13 = vector.load %arg9[%c0_11, %c5, %c0_12] : memref<1x8x64xf32, #tpu.memory_space<vmem>>, vector<1x1x32xf32>
    %14 = vector.shape_cast %13 : vector<1x1x32xf32> to vector<1x32xf32>
    %c0_13 = arith.constant 0 : index
    %c6 = arith.constant 6 : index
    %c0_14 = arith.constant 0 : index
    %15 = vector.load %arg9[%c0_13, %c6, %c0_14] : memref<1x8x64xf32, #tpu.memory_space<vmem>>, vector<1x1x32xf32>
    %16 = vector.shape_cast %15 : vector<1x1x32xf32> to vector<1x32xf32>
    %c0_15 = arith.constant 0 : index
    %c7 = arith.constant 7 : index
    %c0_16 = arith.constant 0 : index
    %17 = vector.load %arg9[%c0_15, %c7, %c0_16] : memref<1x8x64xf32, #tpu.memory_space<vmem>>, vector<1x1x32xf32>
    %18 = vector.shape_cast %17 : vector<1x1x32xf32> to vector<1x32xf32>
    %c0_17 = arith.constant 0 : index
    %c0_18 = arith.constant 0 : index
    %19 = vector.load %arg13[%c0_17, %c0_18] : memref<16x32xf32, #tpu.memory_space<vmem>>, vector<16x32xf32>
    %20 = arith.truncf %19 : vector<16x32xf32> to vector<16x32xbf16>
    %c0_19 = arith.constant 0 : index
    %c0_20 = arith.constant 0 : index
    %c0_21 = arith.constant 0 : index
    %21 = vector.load %arg5[%c0_19, %c0_20, %c0_21] : memref<1x32x96xbf16, #tpu.memory_space<vmem>>, vector<1x32x96xbf16>
    %22 = vector.shape_cast %21 : vector<1x32x96xbf16> to vector<32x96xbf16>
    %cst = arith.constant dense<0.000000e+00> : vector<16x96xf32>
    %23 = tpu.matmul %20, %22, %cst {dimension_numbers = #tpu.dot_dimension_numbers<[1], [0], [0], [1], [0, 0, 1, 1], [], []>} : vector<16x32xbf16>, vector<32x96xbf16>, vector<16x96xf32> -> vector<16x96xf32>
    %24 = vector.extract_strided_slice %23 {offsets = [0, 0], sizes = [16, 32], strides = [1, 1]} : vector<16x96xf32> to vector<16x32xf32>
    %25 = vector.extract_strided_slice %23 {offsets = [0, 32], sizes = [16, 32], strides = [1, 1]} : vector<16x96xf32> to vector<16x32xf32>
    %26 = vector.extract_strided_slice %23 {offsets = [0, 64], sizes = [16, 32], strides = [1, 1]} : vector<16x96xf32> to vector<16x32xf32>
    %27 = vector.broadcast %4 : vector<1x32xf32> to vector<16x32xf32>
    %28 = arith.addf %24, %27 : vector<16x32xf32>
    %cst_22 = arith.constant 2.500000e-01 : f32
    %29 = vector.broadcast %cst_22 : f32 to vector<16x32xf32>
    %30 = arith.mulf %28, %29 : vector<16x32xf32>
    %31 = arith.truncf %30 : vector<16x32xf32> to vector<16x32xbf16>
    %32 = vector.broadcast %6 : vector<1x32xf32> to vector<16x32xf32>
    %33 = arith.addf %24, %32 : vector<16x32xf32>
    %cst_23 = arith.constant 2.500000e-01 : f32
    %34 = vector.broadcast %cst_23 : f32 to vector<16x32xf32>
    %35 = arith.mulf %33, %34 : vector<16x32xf32>
    %36 = arith.truncf %35 : vector<16x32xf32> to vector<16x32xbf16>
    %37 = arith.truncf %25 : vector<16x32xf32> to vector<16x32xbf16>
    %38 = arith.truncf %26 : vector<16x32xf32> to vector<16x32xbf16>
    %c0_24 = arith.constant 0 : index
    %c0_25 = arith.constant 0 : index
    %c0_26 = arith.constant 0 : index
    %39 = vector.load %arg4[%c0_24, %c0_25, %c0_26] : memref<1x128x32xbf16, #tpu.memory_space<vmem>>, vector<1x128x32xbf16>
    %40 = vector.shape_cast %39 : vector<1x128x32xbf16> to vector<128x32xbf16>
    %c0_27 = arith.constant 0 : index
    %c0_28 = arith.constant 0 : index
    %c0_29 = arith.constant 0 : index
    %41 = vector.load %arg6[%c0_27, %c0_28, %c0_29] : memref<1x32x32xbf16, #tpu.memory_space<vmem>>, vector<1x32x32xbf16>
    %42 = vector.shape_cast %41 : vector<1x32x32xbf16> to vector<32x32xbf16>
    %c0_30 = arith.constant 0 : index
    %c0_31 = arith.constant 0 : index
    %c0_32 = arith.constant 0 : index
    %43 = vector.load %arg3[%c0_30, %c0_31, %c0_32] : memref<1x2x8xf32, #tpu.memory_space<vmem>>, vector<1x1x8xf32>
    %44 = vector.shape_cast %43 : vector<1x1x8xf32> to vector<1x8xf32>
    %45 = vector.shape_cast %44 : vector<1x8xf32> to vector<1x8xf32>
    %46 = vector.broadcast %45 : vector<1x8xf32> to vector<8x8xf32>
    %cst_33 = arith.constant 0.000000e+00 : f32
    %47 = vector.broadcast %cst_33 : f32 to vector<8x32xf32>
    %48 = vector.extract_strided_slice %31 {offsets = [0, 0], sizes = [8, 16], strides = [1, 1]} : vector<16x32xbf16> to vector<8x16xbf16>
    %49 = vector.extract_strided_slice %36 {offsets = [0, 0], sizes = [8, 16], strides = [1, 1]} : vector<16x32xbf16> to vector<8x16xbf16>
    %50 = vector.extract_strided_slice %37 {offsets = [0, 0], sizes = [8, 16], strides = [1, 1]} : vector<16x32xbf16> to vector<8x16xbf16>
    %51 = vector.extract_strided_slice %38 {offsets = [0, 0], sizes = [8, 16], strides = [1, 1]} : vector<16x32xbf16> to vector<8x16xbf16>
    %52 = vector.extract_strided_slice %40 {offsets = [0, 0], sizes = [128, 16], strides = [1, 1]} : vector<128x32xbf16> to vector<128x16xbf16>
    %cst_34 = arith.constant dense<0.000000e+00> : vector<8x8xf32>
    %53 = tpu.matmul %48, %50, %cst_34 {dimension_numbers = #tpu.dot_dimension_numbers<[1], [1], [0], [0], [0, 0, 1, 0], [], []>} : vector<8x16xbf16>, vector<8x16xbf16>, vector<8x8xf32> -> vector<8x8xf32>
    %cst_35 = arith.constant dense<0.000000e+00> : vector<8x128xf32>
    %54 = tpu.matmul %49, %52, %cst_35 {dimension_numbers = #tpu.dot_dimension_numbers<[1], [1], [0], [0], [0, 0, 1, 0], [], []>} : vector<8x16xbf16>, vector<128x16xbf16>, vector<8x128xf32> -> vector<8x128xf32>
    %c120_i32 = arith.constant 120 : i32
    %55 = tpu.dynamic_rotate %54 by %c120_i32 dim 1 {stride = 1 : si32, stride_dimension = 0 : si32} : vector<8x128xf32>, i32 -> vector<8x128xf32>
    %56 = vector.extract_strided_slice %55 {offsets = [0, 0], sizes = [8, 8], strides = [1, 1]} : vector<8x128xf32> to vector<8x8xf32>
    %57 = arith.addf %53, %56 : vector<8x8xf32>
    %58 = arith.addf %57, %46 : vector<8x8xf32>
    %cst_36 = arith.constant dense<0xFF800000> : vector<8xf32>
    %59 = vector.multi_reduction <maximumf>, %58, %cst_36 [1] : vector<8x8xf32> to vector<8xf32>
    %60 = vector.shape_cast %59 : vector<8xf32> to vector<8x1xf32>
    %61 = vector.broadcast %60 : vector<8x1xf32> to vector<8x8xf32>
    %62 = arith.subf %58, %61 : vector<8x8xf32>
    %63 = math.exp %62 : vector<8x8xf32>
    %cst_37 = arith.constant dense<0.000000e+00> : vector<8xf32>
    %64 = vector.multi_reduction <add>, %63, %cst_37 [1] : vector<8x8xf32> to vector<8xf32>
    %65 = vector.shape_cast %64 : vector<8xf32> to vector<8x1xf32>
    %66 = tpu.reciprocal %65 {approx = true} : vector<8x1xf32> -> vector<8x1xf32>
    %67 = vector.broadcast %66 : vector<8x1xf32> to vector<8x8xf32>
    %68 = arith.mulf %63, %67 : vector<8x8xf32>
    %69 = arith.truncf %68 : vector<8x8xf32> to vector<8x8xbf16>
    %cst_38 = arith.constant dense<0.000000e+00> : vector<8x16xf32>
    %70 = tpu.matmul %69, %51, %cst_38 {dimension_numbers = #tpu.dot_dimension_numbers<[1], [0], [0], [1], [0, 0, 1, 1], [], []>} : vector<8x8xbf16>, vector<8x16xbf16>, vector<8x16xf32> -> vector<8x16xf32>
    %71 = arith.truncf %70 : vector<8x16xf32> to vector<8x16xbf16>
    %72 = vector.extract_strided_slice %42 {offsets = [0, 0], sizes = [16, 32], strides = [1, 1]} : vector<32x32xbf16> to vector<16x32xbf16>
    %cst_39 = arith.constant dense<0.000000e+00> : vector<8x32xf32>
    %73 = tpu.matmul %71, %72, %cst_39 {dimension_numbers = #tpu.dot_dimension_numbers<[1], [0], [0], [1], [0, 0, 1, 1], [], []>} : vector<8x16xbf16>, vector<16x32xbf16>, vector<8x32xf32> -> vector<8x32xf32>
    %74 = arith.addf %47, %73 : vector<8x32xf32>
    %75 = vector.extract_strided_slice %31 {offsets = [0, 16], sizes = [8, 16], strides = [1, 1]} : vector<16x32xbf16> to vector<8x16xbf16>
    %76 = vector.extract_strided_slice %36 {offsets = [0, 16], sizes = [8, 16], strides = [1, 1]} : vector<16x32xbf16> to vector<8x16xbf16>
    %77 = vector.extract_strided_slice %37 {offsets = [0, 16], sizes = [8, 16], strides = [1, 1]} : vector<16x32xbf16> to vector<8x16xbf16>
    %78 = vector.extract_strided_slice %38 {offsets = [0, 16], sizes = [8, 16], strides = [1, 1]} : vector<16x32xbf16> to vector<8x16xbf16>
    %79 = vector.extract_strided_slice %40 {offsets = [0, 16], sizes = [128, 16], strides = [1, 1]} : vector<128x32xbf16> to vector<128x16xbf16>
    %cst_40 = arith.constant dense<0.000000e+00> : vector<8x8xf32>
    %80 = tpu.matmul %75, %77, %cst_40 {dimension_numbers = #tpu.dot_dimension_numbers<[1], [1], [0], [0], [0, 0, 1, 0], [], []>} : vector<8x16xbf16>, vector<8x16xbf16>, vector<8x8xf32> -> vector<8x8xf32>
    %cst_41 = arith.constant dense<0.000000e+00> : vector<8x128xf32>
    %81 = tpu.matmul %76, %79, %cst_41 {dimension_numbers = #tpu.dot_dimension_numbers<[1], [1], [0], [0], [0, 0, 1, 0], [], []>} : vector<8x16xbf16>, vector<128x16xbf16>, vector<8x128xf32> -> vector<8x128xf32>
    %c120_i32_42 = arith.constant 120 : i32
    %82 = tpu.dynamic_rotate %81 by %c120_i32_42 dim 1 {stride = 1 : si32, stride_dimension = 0 : si32} : vector<8x128xf32>, i32 -> vector<8x128xf32>
    %83 = vector.extract_strided_slice %82 {offsets = [0, 0], sizes = [8, 8], strides = [1, 1]} : vector<8x128xf32> to vector<8x8xf32>
    %84 = arith.addf %80, %83 : vector<8x8xf32>
    %85 = arith.addf %84, %46 : vector<8x8xf32>
    %cst_43 = arith.constant dense<0xFF800000> : vector<8xf32>
    %86 = vector.multi_reduction <maximumf>, %85, %cst_43 [1] : vector<8x8xf32> to vector<8xf32>
    %87 = vector.shape_cast %86 : vector<8xf32> to vector<8x1xf32>
    %88 = vector.broadcast %87 : vector<8x1xf32> to vector<8x8xf32>
    %89 = arith.subf %85, %88 : vector<8x8xf32>
    %90 = math.exp %89 : vector<8x8xf32>
    %cst_44 = arith.constant dense<0.000000e+00> : vector<8xf32>
    %91 = vector.multi_reduction <add>, %90, %cst_44 [1] : vector<8x8xf32> to vector<8xf32>
    %92 = vector.shape_cast %91 : vector<8xf32> to vector<8x1xf32>
    %93 = tpu.reciprocal %92 {approx = true} : vector<8x1xf32> -> vector<8x1xf32>
    %94 = vector.broadcast %93 : vector<8x1xf32> to vector<8x8xf32>
    %95 = arith.mulf %90, %94 : vector<8x8xf32>
    %96 = arith.truncf %95 : vector<8x8xf32> to vector<8x8xbf16>
    %cst_45 = arith.constant dense<0.000000e+00> : vector<8x16xf32>
    %97 = tpu.matmul %96, %78, %cst_45 {dimension_numbers = #tpu.dot_dimension_numbers<[1], [0], [0], [1], [0, 0, 1, 1], [], []>} : vector<8x8xbf16>, vector<8x16xbf16>, vector<8x16xf32> -> vector<8x16xf32>
    %98 = arith.truncf %97 : vector<8x16xf32> to vector<8x16xbf16>
    %99 = vector.extract_strided_slice %42 {offsets = [16, 0], sizes = [16, 32], strides = [1, 1]} : vector<32x32xbf16> to vector<16x32xbf16>
    %cst_46 = arith.constant dense<0.000000e+00> : vector<8x32xf32>
    %100 = tpu.matmul %98, %99, %cst_46 {dimension_numbers = #tpu.dot_dimension_numbers<[1], [0], [0], [1], [0, 0, 1, 1], [], []>} : vector<8x16xbf16>, vector<16x32xbf16>, vector<8x32xf32> -> vector<8x32xf32>
    %101 = arith.addf %74, %100 : vector<8x32xf32>
    %c0_47 = arith.constant 0 : index
    %c1_48 = arith.constant 1 : index
    %c0_49 = arith.constant 0 : index
    %102 = vector.load %arg3[%c0_47, %c1_48, %c0_49] : memref<1x2x8xf32, #tpu.memory_space<vmem>>, vector<1x1x8xf32>
    %103 = vector.shape_cast %102 : vector<1x1x8xf32> to vector<1x8xf32>
    %104 = vector.shape_cast %103 : vector<1x8xf32> to vector<1x8xf32>
    %105 = vector.broadcast %104 : vector<1x8xf32> to vector<8x8xf32>
    %cst_50 = arith.constant 0.000000e+00 : f32
    %106 = vector.broadcast %cst_50 : f32 to vector<8x32xf32>
    %107 = vector.extract_strided_slice %31 {offsets = [8, 0], sizes = [8, 16], strides = [1, 1]} : vector<16x32xbf16> to vector<8x16xbf16>
    %108 = vector.extract_strided_slice %36 {offsets = [8, 0], sizes = [8, 16], strides = [1, 1]} : vector<16x32xbf16> to vector<8x16xbf16>
    %109 = vector.extract_strided_slice %37 {offsets = [8, 0], sizes = [8, 16], strides = [1, 1]} : vector<16x32xbf16> to vector<8x16xbf16>
    %110 = vector.extract_strided_slice %38 {offsets = [8, 0], sizes = [8, 16], strides = [1, 1]} : vector<16x32xbf16> to vector<8x16xbf16>
    %111 = vector.extract_strided_slice %40 {offsets = [0, 0], sizes = [128, 16], strides = [1, 1]} : vector<128x32xbf16> to vector<128x16xbf16>
    %cst_51 = arith.constant dense<0.000000e+00> : vector<8x8xf32>
    %112 = tpu.matmul %107, %109, %cst_51 {dimension_numbers = #tpu.dot_dimension_numbers<[1], [1], [0], [0], [0, 0, 1, 0], [], []>} : vector<8x16xbf16>, vector<8x16xbf16>, vector<8x8xf32> -> vector<8x8xf32>
    %cst_52 = arith.constant dense<0.000000e+00> : vector<8x128xf32>
    %113 = tpu.matmul %108, %111, %cst_52 {dimension_numbers = #tpu.dot_dimension_numbers<[1], [1], [0], [0], [0, 0, 1, 0], [], []>} : vector<8x16xbf16>, vector<128x16xbf16>, vector<8x128xf32> -> vector<8x128xf32>
    %c120_i32_53 = arith.constant 120 : i32
    %114 = tpu.dynamic_rotate %113 by %c120_i32_53 dim 1 {stride = 1 : si32, stride_dimension = 0 : si32} : vector<8x128xf32>, i32 -> vector<8x128xf32>
    %115 = vector.extract_strided_slice %114 {offsets = [0, 0], sizes = [8, 8], strides = [1, 1]} : vector<8x128xf32> to vector<8x8xf32>
    %116 = arith.addf %112, %115 : vector<8x8xf32>
    %117 = arith.addf %116, %105 : vector<8x8xf32>
    %cst_54 = arith.constant dense<0xFF800000> : vector<8xf32>
    %118 = vector.multi_reduction <maximumf>, %117, %cst_54 [1] : vector<8x8xf32> to vector<8xf32>
    %119 = vector.shape_cast %118 : vector<8xf32> to vector<8x1xf32>
    %120 = vector.broadcast %119 : vector<8x1xf32> to vector<8x8xf32>
    %121 = arith.subf %117, %120 : vector<8x8xf32>
    %122 = math.exp %121 : vector<8x8xf32>
    %cst_55 = arith.constant dense<0.000000e+00> : vector<8xf32>
    %123 = vector.multi_reduction <add>, %122, %cst_55 [1] : vector<8x8xf32> to vector<8xf32>
    %124 = vector.shape_cast %123 : vector<8xf32> to vector<8x1xf32>
    %125 = tpu.reciprocal %124 {approx = true} : vector<8x1xf32> -> vector<8x1xf32>
    %126 = vector.broadcast %125 : vector<8x1xf32> to vector<8x8xf32>
    %127 = arith.mulf %122, %126 : vector<8x8xf32>
    %128 = arith.truncf %127 : vector<8x8xf32> to vector<8x8xbf16>
    %cst_56 = arith.constant dense<0.000000e+00> : vector<8x16xf32>
    %129 = tpu.matmul %128, %110, %cst_56 {dimension_numbers = #tpu.dot_dimension_numbers<[1], [0], [0], [1], [0, 0, 1, 1], [], []>} : vector<8x8xbf16>, vector<8x16xbf16>, vector<8x16xf32> -> vector<8x16xf32>
    %130 = arith.truncf %129 : vector<8x16xf32> to vector<8x16xbf16>
    %131 = vector.extract_strided_slice %42 {offsets = [0, 0], sizes = [16, 32], strides = [1, 1]} : vector<32x32xbf16> to vector<16x32xbf16>
    %cst_57 = arith.constant dense<0.000000e+00> : vector<8x32xf32>
    %132 = tpu.matmul %130, %131, %cst_57 {dimension_numbers = #tpu.dot_dimension_numbers<[1], [0], [0], [1], [0, 0, 1, 1], [], []>} : vector<8x16xbf16>, vector<16x32xbf16>, vector<8x32xf32> -> vector<8x32xf32>
    %133 = arith.addf %106, %132 : vector<8x32xf32>
    %134 = vector.extract_strided_slice %31 {offsets = [8, 16], sizes = [8, 16], strides = [1, 1]} : vector<16x32xbf16> to vector<8x16xbf16>
    %135 = vector.extract_strided_slice %36 {offsets = [8, 16], sizes = [8, 16], strides = [1, 1]} : vector<16x32xbf16> to vector<8x16xbf16>
    %136 = vector.extract_strided_slice %37 {offsets = [8, 16], sizes = [8, 16], strides = [1, 1]} : vector<16x32xbf16> to vector<8x16xbf16>
    %137 = vector.extract_strided_slice %38 {offsets = [8, 16], sizes = [8, 16], strides = [1, 1]} : vector<16x32xbf16> to vector<8x16xbf16>
    %138 = vector.extract_strided_slice %40 {offsets = [0, 16], sizes = [128, 16], strides = [1, 1]} : vector<128x32xbf16> to vector<128x16xbf16>
    %cst_58 = arith.constant dense<0.000000e+00> : vector<8x8xf32>
    %139 = tpu.matmul %134, %136, %cst_58 {dimension_numbers = #tpu.dot_dimension_numbers<[1], [1], [0], [0], [0, 0, 1, 0], [], []>} : vector<8x16xbf16>, vector<8x16xbf16>, vector<8x8xf32> -> vector<8x8xf32>
    %cst_59 = arith.constant dense<0.000000e+00> : vector<8x128xf32>
    %140 = tpu.matmul %135, %138, %cst_59 {dimension_numbers = #tpu.dot_dimension_numbers<[1], [1], [0], [0], [0, 0, 1, 0], [], []>} : vector<8x16xbf16>, vector<128x16xbf16>, vector<8x128xf32> -> vector<8x128xf32>
    %c120_i32_60 = arith.constant 120 : i32
    %141 = tpu.dynamic_rotate %140 by %c120_i32_60 dim 1 {stride = 1 : si32, stride_dimension = 0 : si32} : vector<8x128xf32>, i32 -> vector<8x128xf32>
    %142 = vector.extract_strided_slice %141 {offsets = [0, 0], sizes = [8, 8], strides = [1, 1]} : vector<8x128xf32> to vector<8x8xf32>
    %143 = arith.addf %139, %142 : vector<8x8xf32>
    %144 = arith.addf %143, %105 : vector<8x8xf32>
    %cst_61 = arith.constant dense<0xFF800000> : vector<8xf32>
    %145 = vector.multi_reduction <maximumf>, %144, %cst_61 [1] : vector<8x8xf32> to vector<8xf32>
    %146 = vector.shape_cast %145 : vector<8xf32> to vector<8x1xf32>
    %147 = vector.broadcast %146 : vector<8x1xf32> to vector<8x8xf32>
    %148 = arith.subf %144, %147 : vector<8x8xf32>
    %149 = math.exp %148 : vector<8x8xf32>
    %cst_62 = arith.constant dense<0.000000e+00> : vector<8xf32>
    %150 = vector.multi_reduction <add>, %149, %cst_62 [1] : vector<8x8xf32> to vector<8xf32>
    %151 = vector.shape_cast %150 : vector<8xf32> to vector<8x1xf32>
    %152 = tpu.reciprocal %151 {approx = true} : vector<8x1xf32> -> vector<8x1xf32>
    %153 = vector.broadcast %152 : vector<8x1xf32> to vector<8x8xf32>
    %154 = arith.mulf %149, %153 : vector<8x8xf32>
    %155 = arith.truncf %154 : vector<8x8xf32> to vector<8x8xbf16>
    %cst_63 = arith.constant dense<0.000000e+00> : vector<8x16xf32>
    %156 = tpu.matmul %155, %137, %cst_63 {dimension_numbers = #tpu.dot_dimension_numbers<[1], [0], [0], [1], [0, 0, 1, 1], [], []>} : vector<8x8xbf16>, vector<8x16xbf16>, vector<8x16xf32> -> vector<8x16xf32>
    %157 = arith.truncf %156 : vector<8x16xf32> to vector<8x16xbf16>
    %158 = vector.extract_strided_slice %42 {offsets = [16, 0], sizes = [16, 32], strides = [1, 1]} : vector<32x32xbf16> to vector<16x32xbf16>
    %cst_64 = arith.constant dense<0.000000e+00> : vector<8x32xf32>
    %159 = tpu.matmul %157, %158, %cst_64 {dimension_numbers = #tpu.dot_dimension_numbers<[1], [0], [0], [1], [0, 0, 1, 1], [], []>} : vector<8x16xbf16>, vector<16x32xbf16>, vector<8x32xf32> -> vector<8x32xf32>
    %160 = arith.addf %133, %159 : vector<8x32xf32>
    %161 = tpu.concatenate %101, %160 in 0 : vector<8x32xf32>, vector<8x32xf32> -> vector<16x32xf32>
    %162 = arith.addf %19, %161 : vector<16x32xf32>
    %cst_65 = arith.constant dense<0.000000e+00> : vector<16xf32>
    %163 = vector.multi_reduction <add>, %162, %cst_65 [1] : vector<16x32xf32> to vector<16xf32>
    %164 = vector.shape_cast %163 : vector<16xf32> to vector<16x1xf32>
    %cst_66 = arith.constant 3.200000e+01 : f32
    %165 = vector.broadcast %cst_66 : f32 to vector<16x1xf32>
    %166 = arith.divf %164, %165 : vector<16x1xf32>
    %167 = vector.broadcast %166 : vector<16x1xf32> to vector<16x32xf32>
    %168 = arith.subf %162, %167 : vector<16x32xf32>
    %169 = arith.mulf %168, %168 : vector<16x32xf32>
    %cst_67 = arith.constant dense<0.000000e+00> : vector<16xf32>
    %170 = vector.multi_reduction <add>, %169, %cst_67 [1] : vector<16x32xf32> to vector<16xf32>
    %171 = vector.shape_cast %170 : vector<16xf32> to vector<16x1xf32>
    %cst_68 = arith.constant 3.200000e+01 : f32
    %172 = vector.broadcast %cst_68 : f32 to vector<16x1xf32>
    %173 = arith.divf %171, %172 : vector<16x1xf32>
    %174 = vector.broadcast %166 : vector<16x1xf32> to vector<16x32xf32>
    %175 = arith.subf %162, %174 : vector<16x32xf32>
    %cst_69 = arith.constant 9.99999996E-13 : f32
    %176 = vector.broadcast %cst_69 : f32 to vector<16x1xf32>
    %177 = arith.addf %173, %176 : vector<16x1xf32>
    %178 = math.rsqrt %177 : vector<16x1xf32>
    %179 = vector.broadcast %178 : vector<16x1xf32> to vector<16x32xf32>
    %180 = arith.mulf %175, %179 : vector<16x32xf32>
    %181 = vector.broadcast %8 : vector<1x32xf32> to vector<16x32xf32>
    %182 = arith.mulf %180, %181 : vector<16x32xf32>
    %183 = vector.broadcast %10 : vector<1x32xf32> to vector<16x32xf32>
    %184 = arith.addf %182, %183 : vector<16x32xf32>
    %185 = arith.truncf %184 : vector<16x32xf32> to vector<16x32xbf16>
    %c0_70 = arith.constant 0 : index
    %c0_71 = arith.constant 0 : index
    %c0_72 = arith.constant 0 : index
    %186 = vector.load %arg7[%c0_70, %c0_71, %c0_72] : memref<1x32x64xbf16, #tpu.memory_space<vmem>>, vector<1x32x64xbf16>
    %187 = vector.shape_cast %186 : vector<1x32x64xbf16> to vector<32x64xbf16>
    %cst_73 = arith.constant dense<0.000000e+00> : vector<16x64xf32>
    %188 = tpu.matmul %185, %187, %cst_73 {dimension_numbers = #tpu.dot_dimension_numbers<[1], [0], [0], [1], [0, 0, 1, 1], [], []>} : vector<16x32xbf16>, vector<32x64xbf16>, vector<16x64xf32> -> vector<16x64xf32>
    %189 = vector.broadcast %12 : vector<1x64xf32> to vector<16x64xf32>
    %190 = arith.addf %188, %189 : vector<16x64xf32>
    %191 = arith.mulf %190, %190 : vector<16x64xf32>
    %192 = arith.mulf %190, %191 : vector<16x64xf32>
    %cst_74 = arith.constant 4.471500e-02 : f32
    %193 = vector.broadcast %cst_74 : f32 to vector<16x64xf32>
    %194 = arith.mulf %193, %192 : vector<16x64xf32>
    %195 = arith.addf %190, %194 : vector<16x64xf32>
    %cst_75 = arith.constant 0.797884583 : f32
    %196 = vector.broadcast %cst_75 : f32 to vector<16x64xf32>
    %197 = arith.mulf %196, %195 : vector<16x64xf32>
    %198 = math.tanh %197 : vector<16x64xf32>
    %cst_76 = arith.constant 1.000000e+00 : f32
    %199 = vector.broadcast %cst_76 : f32 to vector<16x64xf32>
    %200 = arith.addf %199, %198 : vector<16x64xf32>
    %cst_77 = arith.constant 5.000000e-01 : f32
    %201 = vector.broadcast %cst_77 : f32 to vector<16x64xf32>
    %202 = arith.mulf %201, %200 : vector<16x64xf32>
    %203 = arith.mulf %190, %202 : vector<16x64xf32>
    %204 = arith.truncf %203 : vector<16x64xf32> to vector<16x64xbf16>
    %c0_78 = arith.constant 0 : index
    %c0_79 = arith.constant 0 : index
    %c0_80 = arith.constant 0 : index
    %205 = vector.load %arg8[%c0_78, %c0_79, %c0_80] : memref<1x64x32xbf16, #tpu.memory_space<vmem>>, vector<1x64x32xbf16>
    %206 = vector.shape_cast %205 : vector<1x64x32xbf16> to vector<64x32xbf16>
    %cst_81 = arith.constant dense<0.000000e+00> : vector<16x32xf32>
    %207 = tpu.matmul %204, %206, %cst_81 {dimension_numbers = #tpu.dot_dimension_numbers<[1], [0], [0], [1], [0, 0, 1, 1], [], []>} : vector<16x64xbf16>, vector<64x32xbf16>, vector<16x32xf32> -> vector<16x32xf32>
    %208 = vector.broadcast %14 : vector<1x32xf32> to vector<16x32xf32>
    %209 = arith.addf %207, %208 : vector<16x32xf32>
    %210 = arith.addf %184, %209 : vector<16x32xf32>
    %cst_82 = arith.constant dense<0.000000e+00> : vector<16xf32>
    %211 = vector.multi_reduction <add>, %210, %cst_82 [1] : vector<16x32xf32> to vector<16xf32>
    %212 = vector.shape_cast %211 : vector<16xf32> to vector<16x1xf32>
    %cst_83 = arith.constant 3.200000e+01 : f32
    %213 = vector.broadcast %cst_83 : f32 to vector<16x1xf32>
    %214 = arith.divf %212, %213 : vector<16x1xf32>
    %215 = vector.broadcast %214 : vector<16x1xf32> to vector<16x32xf32>
    %216 = arith.subf %210, %215 : vector<16x32xf32>
    %217 = arith.mulf %216, %216 : vector<16x32xf32>
    %cst_84 = arith.constant dense<0.000000e+00> : vector<16xf32>
    %218 = vector.multi_reduction <add>, %217, %cst_84 [1] : vector<16x32xf32> to vector<16xf32>
    %219 = vector.shape_cast %218 : vector<16xf32> to vector<16x1xf32>
    %cst_85 = arith.constant 3.200000e+01 : f32
    %220 = vector.broadcast %cst_85 : f32 to vector<16x1xf32>
    %221 = arith.divf %219, %220 : vector<16x1xf32>
    %222 = vector.broadcast %214 : vector<16x1xf32> to vector<16x32xf32>
    %223 = arith.subf %210, %222 : vector<16x32xf32>
    %cst_86 = arith.constant 9.99999996E-13 : f32
    %224 = vector.broadcast %cst_86 : f32 to vector<16x1xf32>
    %225 = arith.addf %221, %224 : vector<16x1xf32>
    %226 = math.rsqrt %225 : vector<16x1xf32>
    %227 = vector.broadcast %226 : vector<16x1xf32> to vector<16x32xf32>
    %228 = arith.mulf %223, %227 : vector<16x32xf32>
    %229 = vector.broadcast %16 : vector<1x32xf32> to vector<16x32xf32>
    %230 = arith.mulf %228, %229 : vector<16x32xf32>
    %231 = vector.broadcast %18 : vector<1x32xf32> to vector<16x32xf32>
    %232 = arith.addf %230, %231 : vector<16x32xf32>
    %c0_87 = arith.constant 0 : index
    %c0_88 = arith.constant 0 : index
    %233 = vector.load %arg13[%c0_87, %c0_88] : memref<16x32xf32, #tpu.memory_space<vmem>>, vector<16x32xf32>
    tpu.vector_store %arg13[%c0_87, %c0_88], %232 {strides = array<i32>} : memref<16x32xf32, #tpu.memory_space<vmem>>, vector<16x32xf32>,
    %c1_i32 = arith.constant 1 : i32
    %234 = arith.cmpi eq, %arg1, %c1_i32 : i32
    %235 = arith.extui %234 : i1 to i32
    %c0_i32_89 = arith.constant 0 : i32
    %236 = arith.cmpi ne, %235, %c0_i32_89 : i32
    scf.if %236 {
      %c0_90 = arith.constant 0 : index
      %c0_91 = arith.constant 0 : index
      %237 = vector.load %arg10[%c0_90, %c0_91] : memref<32x8xf32, #tpu.memory_space<vmem>>, vector<32x8xf32>
      %c0_92 = arith.constant 0 : index
      %c0_93 = arith.constant 0 : index
      %238 = vector.load %arg11[%c0_92, %c0_93] : memref<1x8xf32, #tpu.memory_space<vmem>>, vector<1x8xf32>
      %239 = vector.extract_strided_slice %232 {offsets = [0, 0], sizes = [8, 32], strides = [1, 1]} : vector<16x32xf32> to vector<8x32xf32>
      %cst_94 = arith.constant dense<0.000000e+00> : vector<32xf32>
      %240 = vector.multi_reduction <add>, %239, %cst_94 [0] : vector<8x32xf32> to vector<32xf32>
      %241 = vector.shape_cast %240 : vector<32xf32> to vector<1x32xf32>
      %cst_95 = arith.constant 8.000000e+00 : f32
      %242 = vector.broadcast %cst_95 : f32 to vector<1x32xf32>
      %243 = arith.divf %241, %242 : vector<1x32xf32>
      %cst_96 = arith.constant dense<0.000000e+00> : vector<1x8xf32>
      %244 = tpu.matmul %243, %237, %cst_96 {dimension_numbers = #tpu.dot_dimension_numbers<[1], [0], [0], [1], [0, 0, 1, 1], [], []>} : vector<1x32xf32>, vector<32x8xf32>, vector<1x8xf32> -> vector<1x8xf32>
      %245 = arith.addf %244, %238 : vector<1x8xf32>
      %c0_97 = arith.constant 0 : index
      %c0_98 = arith.constant 0 : index
      %c0_99 = arith.constant 0 : index
      %246 = vector.load %arg12[%c0_97, %c0_98, %c0_99] : memref<1x2x8xf32, #tpu.memory_space<vmem>>, vector<1x1x8xf32>
      %247 = vector.shape_cast %246 : vector<1x1x8xf32> to vector<1x8xf32>
      %248 = vector.shape_cast %245 : vector<1x8xf32> to vector<1x1x8xf32>
      tpu.vector_store %arg12[%c0_97, %c0_98, %c0_99], %248 {strides = array<i32>} : memref<1x2x8xf32, #tpu.memory_space<vmem>>, vector<1x1x8xf32>,
      %249 = vector.extract_strided_slice %232 {offsets = [8, 0], sizes = [8, 32], strides = [1, 1]} : vector<16x32xf32> to vector<8x32xf32>
      %cst_100 = arith.constant dense<0.000000e+00> : vector<32xf32>
      %250 = vector.multi_reduction <add>, %249, %cst_100 [0] : vector<8x32xf32> to vector<32xf32>
      %251 = vector.shape_cast %250 : vector<32xf32> to vector<1x32xf32>
      %cst_101 = arith.constant 8.000000e+00 : f32
      %252 = vector.broadcast %cst_101 : f32 to vector<1x32xf32>
      %253 = arith.divf %251, %252 : vector<1x32xf32>
      %cst_102 = arith.constant dense<0.000000e+00> : vector<1x8xf32>
      %254 = tpu.matmul %253, %237, %cst_102 {dimension_numbers = #tpu.dot_dimension_numbers<[1], [0], [0], [1], [0, 0, 1, 1], [], []>} : vector<1x32xf32>, vector<32x8xf32>, vector<1x8xf32> -> vector<1x8xf32>
      %255 = arith.addf %254, %238 : vector<1x8xf32>
      %c0_103 = arith.constant 0 : index
      %c1_104 = arith.constant 1 : index
      %c0_105 = arith.constant 0 : index
      %256 = vector.load %arg12[%c0_103, %c1_104, %c0_105] : memref<1x2x8xf32, #tpu.memory_space<vmem>>, vector<1x1x8xf32>
      %257 = vector.shape_cast %256 : vector<1x1x8xf32> to vector<1x8xf32>
      %258 = vector.shape_cast %255 : vector<1x8xf32> to vector<1x1x8xf32>
      tpu.vector_store %arg12[%c0_103, %c1_104, %c0_105], %258 {strides = array<i32>} : memref<1x2x8xf32, #tpu.memory_space<vmem>>, vector<1x1x8xf32>,
    } else {
    }
    return
  }
  func.func @transform_0(%arg0: i32, %arg1: i32) -> (i32, i32, i32) {
    %c0_i32 = arith.constant 0 : i32
    %c0_i32_0 = arith.constant 0 : i32
    %c0_i32_1 = arith.constant 0 : i32
    return %arg0, %c0_i32, %c0_i32_0 : i32, i32, i32
  }
  func.func @transform_1(%arg0: i32, %arg1: i32) -> (i32, i32, i32) {
    %c0_i32 = arith.constant 0 : i32
    %c0_i32_0 = arith.constant 0 : i32
    %c0_i32_1 = arith.constant 0 : i32
    return %arg0, %c0_i32, %c0_i32_0 : i32, i32, i32
  }
  func.func @transform_2(%arg0: i32, %arg1: i32) -> (i32, i32, i32) {
    %c0_i32 = arith.constant 0 : i32
    %c0_i32_0 = arith.constant 0 : i32
    %c0_i32_1 = arith.constant 0 : i32
    return %arg1, %c0_i32, %c0_i32_0 : i32, i32, i32
  }
  func.func @transform_3(%arg0: i32, %arg1: i32) -> (i32, i32, i32) {
    %c0_i32 = arith.constant 0 : i32
    %c0_i32_0 = arith.constant 0 : i32
    %c0_i32_1 = arith.constant 0 : i32
    return %arg1, %c0_i32, %c0_i32_0 : i32, i32, i32
  }
  func.func @transform_4(%arg0: i32, %arg1: i32) -> (i32, i32, i32) {
    %c0_i32 = arith.constant 0 : i32
    %c0_i32_0 = arith.constant 0 : i32
    %c0_i32_1 = arith.constant 0 : i32
    return %arg1, %c0_i32, %c0_i32_0 : i32, i32, i32
  }
  func.func @transform_5(%arg0: i32, %arg1: i32) -> (i32, i32, i32) {
    %c0_i32 = arith.constant 0 : i32
    %c0_i32_0 = arith.constant 0 : i32
    %c0_i32_1 = arith.constant 0 : i32
    return %arg1, %c0_i32, %c0_i32_0 : i32, i32, i32
  }
  func.func @transform_6(%arg0: i32, %arg1: i32) -> (i32, i32, i32) {
    %c0_i32 = arith.constant 0 : i32
    %c0_i32_0 = arith.constant 0 : i32
    %c0_i32_1 = arith.constant 0 : i32
    return %arg1, %c0_i32, %c0_i32_0 : i32, i32, i32
  }
  func.func @transform_7(%arg0: i32, %arg1: i32) -> (i32, i32, i32) {
    %c0_i32 = arith.constant 0 : i32
    %c0_i32_0 = arith.constant 0 : i32
    %c0_i32_1 = arith.constant 0 : i32
    return %arg1, %c0_i32, %c0_i32_0 : i32, i32, i32
  }
  func.func @transform_8(%arg0: i32, %arg1: i32) -> (i32, i32) {
    %c0_i32 = arith.constant 0 : i32
    %c0_i32_0 = arith.constant 0 : i32
    %c0_i32_1 = arith.constant 0 : i32
    return %c0_i32, %c0_i32_0 : i32, i32
  }
  func.func @transform_9(%arg0: i32, %arg1: i32) -> (i32, i32) {
    %c0_i32 = arith.constant 0 : i32
    %c0_i32_0 = arith.constant 0 : i32
    %c0_i32_1 = arith.constant 0 : i32
    return %c0_i32, %c0_i32_0 : i32, i32
  }
  func.func @transform_10(%arg0: i32, %arg1: i32) -> (i32, i32, i32) {
    %c0_i32 = arith.constant 0 : i32
    %c0_i32_0 = arith.constant 0 : i32
    %c0_i32_1 = arith.constant 0 : i32
    return %arg0, %c0_i32, %c0_i32_0 : i32, i32, i32
  }
}

</mosaic_0001>

<bundles_post_ra>
// kernel: xlnet_forward.1
= control target key start
LH: loop header
LB: loop body
LE: loop exit
PB: predicated region body
PF: predicated region fallthrough
CT: control target
= control target key end

     0   :  { %15 = vsyncpa [#allocation4], 0  ;;  %s2698_s13 = smov 0   ;;  %s2700_s14 = smov 0   ;;  %s3143_s0 = inlined_call_operand.vmem [shape: f32[1,16,32], index: 0, kind: input, shape index: {}]   ;;  %s3144_s1 = inlined_call_operand.vmem [shape: f32[1,2,8], index: 1, kind: input, shape index: {}]   ;;  %s3145_s2 = inlined_call_operand.vmem [shape: bf16[2,128,32], index: 2, kind: input, shape index: {}]   ;;  %s3146_s3 = inlined_call_operand.vmem [shape: bf16[2,32,96], index: 3, kind: input, shape index: {}]   ;;  %s3147_s4 = inlined_call_operand.vmem [shape: bf16[2,32,32], index: 4, kind: input, shape index: {}]   ;;  %s3148_s5 = inlined_call_operand.vmem [shape: bf16[2,32,64], index: 5, kind: input, shape index: {}]   ;;  %s3149_s6 = inlined_call_operand.vmem [shape: bf16[2,64,32], index: 6, kind: input, shape index: {}]   ;;  %s3150_s7 = inlined_call_operand.vmem [shape: f32[2,8,64], index: 7, kind: input, shape index: {}]   ;;  %s3151_s8 = inlined_call_operand.vmem [shape: f32[32,8], index: 8, kind: input, shape index: {}]   ;;  %s3152_s9 = inlined_call_operand.vmem [shape: f32[1,8], index: 9, kind: input, shape index: {}]   ;;  %s3153_s10 = inlined_call_operand.hbm [shape: f32[1,2,8], index: 10, kind: output, shape index: {}]  }
   0x1   :  { %s2702_s15 = smov 0  }
   0x2 LB: > { %3155 = sst [smem:[#allocation6_spill]] %s2626_s14  ;;  %s30_s17 = sadd.s32 1, %s2626_s14  ;;  %s2630_s15 = sphi %s2702_s15, %s21_s15   ;;  %s2626_s14 = sphi %s2700_s14, %s3160_s14   ;;  %s2622_s13 = sphi %s2698_s13, %s3159_s13  }
   0x3   : > { %p31_p0 = scmp.ge.s32.totalorder %s30_s17, 2  ;;  %p2138_p1 = scmp.ge.s32.totalorder %s2630_s15, 1 }
   0x4   : > { %p393_p2 = scmp.lt.s32.totalorder %s2630_s15, 3 }
   0x5   : > { %s3162_s17 = smov (%p31_p0, %s30_s17), 0 }
   0x6   : > { %3156 = sst [smem:[#allocation7_spill]] %s3162_s17  ;;  %p394_p3 = pnand %p2138_p1, %p393_p2 }
   0x7   : > { %p468_p4 = scmp.lt.s32.totalorder (!%p394_p3), %s2622_s13, 1  ;;  %p2150_p5 = scmp.ne.s32.totalorder (!%p394_p3), %s2622_s13, 0 }
   0x8   : > { %397 = sbr.rel (%p394_p3) target bundleno = 4803 (0x12c3), region = 60 }
   0xd   : > { %s469_s18 = scalar_select %p468_p4, %s2622_s13, 1 }
   0xf   : > { %s2205_s19 = sshll.u32 %s469_s18, 6  ;;  %s2206_s20 = sshll.u32 %s469_s18, 4 }
  0x10   : > { %s2724_s23 = scalar_lea.vmem %s3145_s2, %s2205_s19  ;;  %s477_s26 = scalar_lea.vmem %s3146_s3, %s2206_s20 }
  0x11   : > { %s2732_s29 = scalar_lea.vmem %s3147_s4, %s2206_s20  ;;  %s2737_s12 = scalar_lea.vmem %s3148_s5, %s2206_s20 }
  0x12   : > { %s2209_s16 = sshll.u32 %s469_s18, 5  ;;  %s2149_s17 = sshll.u32 %s469_s18, 3 }
  0x13   : > { %s2742_s19 = scalar_lea.vmem %s3149_s6, %s2209_s16  ;;  %s2747_s25 = scalar_lea.vmem %s3150_s7, %s2149_s17 }
  0x14   : > { %501 = sbr.rel (%p2150_p5) target bundleno = 27 (0x1b), region = 64 }
  0x19   : > { %v502_v0 = vld [vmem:[%s3143_s0] sm:$0xff]  ;;  %vm504_vm0 = vcmask 261120   ;;  %v503_v1 = vld [vmem:[%s3143_s0 + $0x8] sm:$0xff] }
  0x1a   : > { %505 = vst.msk [vmem:[#allocation2] sm:$0xff] %vm504_vm0, %v502_v0  ;;  %506 = vst.msk [vmem:[#allocation2 + $0x8] sm:$0xff] %vm504_vm0, %v503_v1 }
  0x1b PF: > { %v2534_v2 = vld [vmem:[%s477_s26 + $0x8] sm:$0xff]   ;;  %v2632_v3 = vmov 0.0   ;;  %v2535_v4 = vld [vmem:[%s477_s26] sm:$0xff]   ;;  %vm2633_vm1 = vmmov 0   ;;  %v2766_v7 = vld [vmem:[%s2724_s23 + $0x38] sm:$0xff]   ;;  %vm663_vm2 = vcmask 130048  }
  0x1c   : > { %2291 = vmatprep.subr.bf16.mxu1 %v2632_v3  ;;  %2319 = vmatprep.subr.bf16.mxu0 %v2632_v3  ;;  %vm534_vm3 = vcmask 261120   ;;  %v2775_v9 = vsel %vm663_vm2, %v2766_v7, 0  ;;  %v2778_v10 = vld [vmem:[%s2724_s23 + $0x30] sm:$0xff]   ;;  %v2538_v12 = vld [vmem:[%s2724_s23 + $0x28] sm:$0xff]   ;;  %v2539_v14 = vld [vmem:[%s2724_s23 + $0x20] sm:$0xff]   ;;  %s2634_s14 = smov 96  }
  0x1d   : > { %2292 = vmatpush3.bf16.msra.mxu1 %v2534_v2  ;;  %2295 = vmatprep.mubr.msk.bf16.mxu1 %vm2633_vm1, %v2632_v3  ;;  %v2787_v11 = vsel %vm663_vm2, %v2778_v10, 0  ;;  %v2793_v13 = vsel %vm663_vm2, %v2538_v12, 0  ;;  %v2799_v15 = vsel %vm663_vm2, %v2539_v14, 0  ;;  %v2540_v16 = vld [vmem:[%s2724_s23 + $0x18] sm:$0xff]   ;;  %v2810_v18 = vld [vmem:[%s2724_s23 + $0x10] sm:$0xff]   ;;  %v2542_v20 = vld [vmem:[%s2724_s23 + $0x8] sm:$0xff]  }
  0x1e   : > { %2293 = vmatprep.subr.bf16.mxu1 %v2632_v3  ;;  %2321 = vmatprep.mubr.msk.bf16.mxu0 %vm2633_vm1, %v2632_v3  ;;  %v2805_v17 = vsel %vm663_vm2, %v2540_v16, 0  ;;  %v2814_v19 = vsel %vm663_vm2, %v2810_v18, 0  ;;  %v2820_v21 = vsel %vm663_vm2, %v2542_v20, 0  ;;  %v2825_v22 = vld [vmem:[%s2724_s23] sm:$0xff]   ;;  %s2635_s16 = smov 376   ;;  %s2636_s17 = smov 64  }
  0x1f   : > { %v2829_v23 = vsel %vm663_vm2, %v2825_v22, 0  ;;  %v2154_v24 = vld [vmem:[%s2747_s25] ss:$0 sm:$0xff]  ;;  %v2155_v25 = vld [vmem:[%s2747_s25 + $0x1] ss:$0 sm:$0xff]  ;;  %s2637_s23 = smov 112  }
  0x20   : > { %vm803_vm4 = vcmask 1043456   ;;  %v2869_v50 = vld [vmem:[%s3144_s1] ss:$0 sm:$0xff]  ;;  %vm785_vm5 = vcmask 64512   ;;  %s2638_s11 = smov 80   ;;  %s2639_s21 = smov 48  }
  0x21   : > { %v2760_v5 = vld [vmem:[#allocation2] sm:$0xff]  ;;  %v2762_v6 = vld [vmem:[#allocation2 + $0x8] sm:$0xff]  ;;  %2294 = vmatpush3.bf16.msra.mxu1 %v2535_v4  ;;  %vm1722_vm6 = vcmask 523264   ;;  %p2198_p6 = scmp.ne.s32.totalorder %s2622_s13, 1 }
  0x22   : > { %v517_v8 = vpack.c.bf16 %v2762_v6, %v2760_v5  ;;  %2299 = vmatprep.subr.bf16.mxu1 %v2632_v3 }
  0x24   : > { %2296 = vmatmul.mubr.msk.bf16.vlgmr.msra.gmra.mxu1 %vm534_vm3, %v517_v8 }
  0x25   : > { %2300 = vmatpush3.bf16.xpose.msra.mxu1 %v2775_v9  ;;  %2315 = vmatprep.mubr.msk.bf16.mxu1 %vm2633_vm1, %v2632_v3 }
  0x26   : > { %2301 = vmatprep.subr.bf16.mxu1 %v2632_v3 }
  0x2d   : > { %2302 = vmatpush3.bf16.xpose.msra.mxu1 %v2787_v11 }
  0x2e   : > { %2303 = vmatprep.subr.bf16.mxu1 %v2632_v3 }
  0x35   : > { %2304 = vmatpush3.bf16.xpose.msra.mxu1 %v2793_v13 }
  0x36   : > { %2305 = vmatprep.subr.bf16.mxu1 %v2632_v3 }
  0x3d   : > { %2306 = vmatpush3.bf16.xpose.msra.mxu1 %v2799_v15 }
  0x3e   : > { %2307 = vmatprep.subr.bf16.mxu1 %v2632_v3 }
  0x45   : > { %2308 = vmatpush3.bf16.xpose.msra.mxu1 %v2805_v17 }
  0x46   : > { %2309 = vmatprep.subr.bf16.mxu1 %v2632_v3 }
  0x4d   : > { %2310 = vmatpush3.bf16.xpose.msra.mxu1 %v2814_v19 }
  0x4e   : > { %2311 = vmatprep.subr.bf16.mxu1 %v2632_v3 }
  0x55   : > { %2312 = vmatpush3.bf16.xpose.msra.mxu1 %v2820_v21 }
  0x56   : > { %2313 = vmatprep.subr.bf16.mxu1 %v2632_v3 }
  0x5d   : > { %2314 = vmatpush3.bf16.xpose.msra.mxu1 %v2829_v23 }
  0x5e   : > { %2351 = vmatprep.subr.bf16.mxu1 %v2632_v3 }
  0xe4   : > { %v572_v26 = vpop.f32.mrf.mxu1 }
  0xe5   : > { %v583_v28 = vadd.f32 %v2154_v24, %v572_v26  ;;  %v592_v29 = vadd.f32 %v2155_v25, %v572_v26 }
  0xe6   : > { %v2297_v27 = vpop.f32.mrf.mxu1 }
  0xe7   : > { %v585_v35 = vmul.f32 0.25, %v583_v28  ;;  %v594_v36 = vmul.f32 0.25, %v592_v29 }
  0xe8   : > { %v575_v30 = vpop.f32.mrf.mxu1 }
  0xe9   : > { %v584_v31 = vadd.f32 %v2154_v24, %v575_v30  ;;  %v593_v32 = vadd.f32 %v2155_v25, %v575_v30  ;;  %v2835_v33 = vpack.c.bf16 %v575_v30, %v572_v26 }
  0xea   : > { %v2298_v34 = vpop.f32.mrf.mxu1 }
  0xeb   : > { %v586_v37 = vmul.f32 0.25, %v584_v31  ;;  %v595_v38 = vmul.f32 0.25, %v593_v32  ;;  %736 = vrot.lane.b32.xlu0 %v2835_v33, %s2634_s14 }
  0xed   : > { %v2839_v39 = vpack.c.bf16 %v586_v37, %v585_v35  ;;  %v2841_v40 = vpack.c.bf16 %v595_v38, %v594_v36  ;;  %v2933_v35 = vld [vmem:[%s2732_s29] sm:$0xff]  }
  0xef   : > { %2316 = vmatmul.mubr.msk.bf16.vlgmr.msra.gmra.mxu1 %vm663_vm2, %v2841_v40 }
  0xf0   : > { %2353 = vmatprep.mubr.msk.bf16.mxu1 %vm2633_vm1, %v2632_v3 }
 0x15d   : > { %v737_v41 = vpop.permute.xlu0 %736 }
 0x15e   : > { %v742_v42 = vsel %vm663_vm2, %v737_v41, 0 }
 0x15f   : > { %2320 = vmatpush3.bf16.xpose.msra.mxu0 %v742_v42 }
 0x160   : > { %2325 = vmatprep.subr.bf16.mxu0 %v2632_v3 }
 0x166   : > { %2322 = vmatmul.mubr.msk.bf16.vlgmr.msra.gmra.mxu0 %vm663_vm2, %v2839_v39 }
 0x167   : > { %2327 = vmatprep.mubr.msk.bf16.mxu0 %vm2633_vm1, %v2632_v3 }
 0x1af   : > { %v725_v43 = vpop.f32.mrf.mxu1 }
 0x1b0   : > { %733 = vrot.lane.b32.xlu0 %v725_v43, %s2635_s16 }
 0x1b1   : > { %v2317_v44 = vpop.f32.mrf.mxu1 }
 0x1b3   : > { %v728_v45 = vpop.f32.mrf.mxu1 }
 0x1b4   : > { %798 = vrot.lane.b32.xlu0 %v2835_v33, %s2636_s17 }
 0x1b5   : > { %v2318_v46 = vpop.f32.mrf.mxu1 }
 0x1b8   : > { %863 = vrot.lane.b32.xlu0 %v2778_v10, %s2637_s23 }
 0x1bc   : > { %861 = vrot.lane.b32.xlu0 %v2538_v12, %s2637_s23 }
 0x1c0   : > { %859 = vrot.lane.b32.xlu0 %v2539_v14, %s2637_s23 }
 0x1c4   : > { %857 = vrot.lane.b32.xlu0 %v2540_v16, %s2637_s23 }
 0x1c8   : > { %853 = vrot.lane.b32.xlu0 %v2542_v20, %s2637_s23 }
 0x1cc   : > { %849 = vrot.lane.b32.xlu0 %v2841_v40, %s2637_s23 }
 0x1d0   : > { %939 = vrot.lane.b32.xlu0 %v2839_v39, %s2637_s23 }
 0x222   : > { %v734_v47 = vpop.permute.xlu0 %733 }
 0x226   : > { %v799_v48 = vpop.permute.xlu0 %798  ;;  %v778_v49 = vpop.f32.mrf.mxu0 }
 0x227   : > { %v805_v51 = vsel %vm803_vm4, %v799_v48, 0  ;;  %v779_v52 = vadd.f32 %v778_v49, %v734_v47 }
 0x228   : > { %v2323_v53 = vpop.f32.mrf.mxu0  ;;  %2326 = vmatpush3.bf16.msra.mxu0 %v805_v51 }
 0x229   : > { %v784_v54 = vadd.f32 %v2869_v50, %v779_v52  ;;  %2331 = vmatprep.subr.bf16.mxu0 %v2632_v3 }
 0x22a   : > { %v781_v55 = vpop.f32.mrf.mxu0  ;;  %v864_v63 = vpop.permute.xlu0 %863 }
 0x22b   : > { %v786_v56 = vsel %vm785_vm5, %v784_v54, -inf  ;;  %v2895_v27 = vsel %vm663_vm2, %v864_v63, 0 }
 0x22c   : > { %787 = vmax.xlane.f32.xlu1 %v786_v56  ;;  %v2324_v57 = vpop.f32.mrf.mxu0 }
 0x22e   : > { %v862_v0 = vpop.permute.xlu0 %861 }
 0x22f   : > { %v2903_v28 = vsel %vm663_vm2, %v862_v0, 0 }
 0x232   : > { %v860_v1 = vpop.permute.xlu0 %859 }
 0x233   : > { %v2908_v29 = vsel %vm663_vm2, %v860_v1, 0 }
 0x236   : > { %v858_v8 = vpop.permute.xlu0 %857 }
 0x237   : > { %v2913_v30 = vsel %vm663_vm2, %v858_v8, 0 }
 0x23a   : > { %v854_v12 = vpop.permute.xlu0 %853 }
 0x23b   : > { %v2923_v32 = vsel %vm663_vm2, %v854_v12, 0  ;;  %v1202_v12 = vrot.slane %v2839_v39, 4 }
 0x23e   : > { %v850_v25 = vpop.permute.xlu0 %849 }
 0x242   : > { %v940_v26 = vpop.permute.xlu0 %939 }
 0x2b5   : > { %v788_v58 = vpop.xlane.xlu1 %787 }
 0x2b6   : > { %v789_v59 = vsub.f32 %v784_v54, %v788_v58 }
 0x2b8   : > { %v790_v60 = vmul.f32 1.442695, %v789_v59 }
 0x2ba   : > { %2552 = vpow2.f32 %v790_v60 }
 0x2c7   : > { %v2553_v61 = vpop.eup %2552 }
 0x2c8   : > { %v792_v62 = vsel %vm785_vm5, %v2553_v61, 0.0 }
 0x2c9   : > { %793 = vadd.xlane.f32.xlu1 %v792_v62 }
 0x2da   : > { %865 = vrot.lane.b32.xlu1 %v2766_v7, %s2637_s23 }
 0x2de   : > { %855 = vrot.lane.b32.xlu1 %v2810_v18, %s2637_s23 }
 0x2e2   : > { %851 = vrot.lane.b32.xlu1 %v2825_v22, %s2637_s23 }
 0x2e6   : > { %941 = vrot.lane.b32.xlu1 %v2835_v33, %s2638_s11 }
 0x352   : > { %v794_v2 = vpop.xlane.xlu1 %793 }
 0x353   : > { %2554 = vrcp.f32 %v794_v2  ;;  %v2954_v2 = vrot.slane %v2835_v33, 4 }
 0x356   : > { %v866_v4 = vpop.permute.xlu1 %865 }
 0x357   : > { %v2885_v20 = vsel %vm663_vm2, %v866_v4, 0 }
 0x35a   : > { %v856_v10 = vpop.permute.xlu1 %855 }
 0x35b   : > { %v2918_v31 = vsel %vm663_vm2, %v856_v10, 0 }
 0x35e   : > { %v852_v7 = vpop.permute.xlu1 %851 }
 0x35f   : > { %v2928_v34 = vsel %vm663_vm2, %v852_v7, 0 }
 0x360   : > { %v2555_v14 = vpop.eup %2554 }
 0x361   : > { %v796_v16 = vmul.f32 %v2555_v14, %v2553_v61 }
 0x362   : > { %v942_v18 = vpop.permute.xlu1 %941 }
 0x363   : > { %v947_v22 = vsel %vm663_vm2, %v942_v18, 0  ;;  %v797_v24 = vpack.c.bf16 %v796_v16, %v796_v16  ;;  %v2970_v16 = vld [vmem:[%s2732_s29 + $0x8] sm:$0xff]  }
 0x364   : > { %2352 = vmatpush3.bf16.xpose.msra.mxu1 %v947_v22 }
 0x365   : > { %2328 = vmatmul.mubr.msk.bf16.vlgmr.msra.gmra.mxu0 %vm785_vm5, %v797_v24  ;;  %2357 = vmatprep.subr.bf16.mxu1 %v2632_v3 }
 0x366   : > { %2332 = vmatpush3.bf16.xpose.msra.mxu0 %v2885_v20  ;;  %2347 = vmatprep.mubr.msk.bf16.mxu0 %vm2633_vm1, %v2632_v3 }
 0x367   : > { %2333 = vmatprep.subr.bf16.mxu0 %v2632_v3 }
 0x36b   : > { %2354 = vmatmul.mubr.msk.bf16.vlgmr.msra.gmra.mxu1 %vm663_vm2, %v940_v26 }
 0x36c   : > { %2359 = vmatprep.mubr.msk.bf16.mxu1 %vm2633_vm1, %v2632_v3 }
 0x36e   : > { %2334 = vmatpush3.bf16.xpose.msra.mxu0 %v2895_v27 }
 0x36f   : > { %2335 = vmatprep.subr.bf16.mxu0 %v2632_v3 }
 0x376   : > { %2336 = vmatpush3.bf16.xpose.msra.mxu0 %v2903_v28 }
 0x377   : > { %2337 = vmatprep.subr.bf16.mxu0 %v2632_v3 }
 0x37e   : > { %2338 = vmatpush3.bf16.xpose.msra.mxu0 %v2908_v29 }
 0x37f   : > { %2339 = vmatprep.subr.bf16.mxu0 %v2632_v3 }
 0x386   : > { %2340 = vmatpush3.bf16.xpose.msra.mxu0 %v2913_v30 }
 0x387   : > { %2341 = vmatprep.subr.bf16.mxu0 %v2632_v3 }
 0x38e   : > { %2342 = vmatpush3.bf16.xpose.msra.mxu0 %v2918_v31 }
 0x38f   : > { %2343 = vmatprep.subr.bf16.mxu0 %v2632_v3 }
 0x396   : > { %2344 = vmatpush3.bf16.xpose.msra.mxu0 %v2923_v32 }
 0x397   : > { %2345 = vmatprep.subr.bf16.mxu0 %v2632_v3 }
 0x39e   : > { %2346 = vmatpush3.bf16.xpose.msra.mxu0 %v2928_v34 }
 0x39f   : > { %2369 = vmatprep.subr.bf16.mxu0 %v2632_v3 }
 0x3a5   : > { %2348 = vmatmul.mubr.msk.bf16.vlgmr.msra.gmra.mxu0 %vm663_vm2, %v850_v25 }
 0x3a6   : > { %2370 = vmatpush3.bf16.msra.mxu0 %v2933_v35  ;;  %2371 = vmatprep.mubr.msk.bf16.mxu0 %vm2633_vm1, %v2632_v3 }
 0x3a7   : > { %2395 = vmatprep.subr.bf16.mxu0 %v2632_v3 }
 0x425   : > { %v841_v36 = vpop.f32.mrf.mxu0 }
 0x426   : > { %v847_v37 = vpack.c.bf16 %v841_v36, %v841_v36 }
 0x427   : > { %v2329_v38 = vpop.f32.mrf.mxu0 }
 0x428   : > { %2372 = vmatmul.mubr.msk.bf16.vlgmr.msra.gmra.mxu0 %vm663_vm2, %v847_v37 }
 0x429   : > { %v844_v41 = vpop.f32.mrf.mxu0  ;;  %2397 = vmatprep.mubr.msk.bf16.mxu0 %vm2633_vm1, %v2632_v3 }
 0x42b   : > { %v2330_v42 = vpop.f32.mrf.mxu0  ;;  %v983_v43 = vpop.f32.mrf.mxu1 }
 0x42d   : > { %v2355_v44 = vpop.f32.mrf.mxu1 }
 0x42f   : > { %v986_v45 = vpop.f32.mrf.mxu1 }
 0x431   : > { %v2356_v46 = vpop.f32.mrf.mxu1 }
 0x465   : > { %v928_v47 = vpop.f32.mrf.mxu0 }
 0x466   : > { %936 = vrot.lane.b32.xlu1 %v928_v47, %s2635_s16 }
 0x467   : > { %v2349_v48 = vpop.f32.mrf.mxu0 }
 0x469   : > { %v931_v49 = vpop.f32.mrf.mxu0 }
 0x46b   : > { %v2350_v51 = vpop.f32.mrf.mxu0 }
 0x4d8   : > { %v937_v52 = vpop.permute.xlu1 %936 }
 0x4d9   : > { %v984_v53 = vadd.f32 %v983_v43, %v937_v52 }
 0x4db   : > { %v989_v54 = vadd.f32 %v2869_v50, %v984_v53 }
 0x4dd   : > { %v990_v55 = vsel %vm785_vm5, %v989_v54, -inf }
 0x4de   : > { %991 = vmax.xlane.f32.xlu0 %v990_v55 }
 0x4e8   : > { %v2946_v56 = vpop.f32.mrf.mxu0 }
 0x4ea   : > { %v2373_v57 = vpop.f32.mrf.mxu0 }
 0x4ec   : > { %v1146_v58 = vpop.f32.mrf.mxu0 }
 0x4ee   : > { %v2374_v59 = vpop.f32.mrf.mxu0 }
 0x4f4   : > { %1002 = vrot.lane.b32.xlu0 %v2835_v33, %s2639_s21 }
 0x567   : > { %v992_v60 = vpop.xlane.xlu0 %991 }
 0x568   : > { %v993_v61 = vsub.f32 %v989_v54, %v992_v60 }
 0x56a   : > { %v994_v62 = vmul.f32 1.442695, %v993_v61 }
 0x56b   : > { %v1003_v63 = vpop.permute.xlu0 %1002 }
 0x56c   : > { %2556 = vpow2.f32 %v994_v62  ;;  %v1008_v0 = vsel %vm803_vm4, %v1003_v63, 0 }
 0x56d   : > { %2358 = vmatpush3.bf16.msra.mxu1 %v1008_v0 }
 0x56e   : > { %2363 = vmatprep.subr.bf16.mxu1 %v2632_v3 }
 0x579   : > { %v2557_v50 = vpop.eup %2556 }
 0x57a   : > { %v996_v1 = vsel %vm785_vm5, %v2557_v50, 0.0 }
 0x57b   : > { %997 = vadd.xlane.f32.xlu1 %v996_v1 }
 0x58c   : > { %1204 = vrot.lane.b32.xlu1 %v2954_v2, %s2634_s14 }
 0x604   : > { %v998_v4 = vpop.xlane.xlu1 %997 }
 0x605   : > { %2558 = vrcp.f32 %v998_v4 }
 0x608   : > { %v1205_v8 = vpop.permute.xlu1 %1204 }
 0x609   : > { %v1210_v10 = vsel %vm663_vm2, %v1205_v8, 0 }
 0x60a   : > { %2396 = vmatpush3.bf16.xpose.msra.mxu0 %v1210_v10 }
 0x60b   : > { %2401 = vmatprep.subr.bf16.mxu0 %v2632_v3 }
 0x611   : > { %2398 = vmatmul.mubr.msk.bf16.vlgmr.msra.gmra.mxu0 %vm663_vm2, %v1202_v12 }
 0x612   : > { %v2559_v33 = vpop.eup %2558  ;;  %2403 = vmatprep.mubr.msk.bf16.mxu0 %vm2633_vm1, %v2632_v3 }
 0x613   : > { %v1000_v7 = vmul.f32 %v2559_v33, %v2557_v50 }
 0x615   : > { %v1001_v14 = vpack.c.bf16 %v1000_v7, %v1000_v7 }
 0x617   : > { %2360 = vmatmul.mubr.msk.bf16.vlgmr.msra.gmra.mxu1 %vm785_vm5, %v1001_v14 }
 0x618   : > { %2365 = vmatprep.mubr.msk.bf16.mxu1 %vm2633_vm1, %v2632_v3  ;;  %2364 = vmatpush3.bf16.msra.mxu1 %v2970_v16 }
 0x619   : > { %2375 = vmatprep.subr.bf16.mxu1 %v2632_v3 }
 0x6d1   : > { %v1246_v18 = vpop.f32.mrf.mxu0 }
 0x6d3   : > { %v2399_v22 = vpop.f32.mrf.mxu0 }
 0x6d5   : > { %v1249_v24 = vpop.f32.mrf.mxu0 }
 0x6d7   : > { %v1044_v25 = vpop.f32.mrf.mxu1  ;;  %v2400_v26 = vpop.f32.mrf.mxu0 }
 0x6d8   : > { %v1050_v36 = vpack.c.bf16 %v1044_v25, %v1044_v25 }
 0x6d9   : > { %v2361_v37 = vpop.f32.mrf.mxu1 }
 0x6da   : > { %2366 = vmatmul.mubr.msk.bf16.vlgmr.msra.gmra.mxu1 %vm663_vm2, %v1050_v36 }
 0x6db   : > { %2376 = vmatpush3.bf16.xpose.msra.mxu1 %v2775_v9  ;;  %v1047_v38 = vpop.f32.mrf.mxu1  ;;  %2391 = vmatprep.mubr.msk.bf16.mxu1 %vm2633_vm1, %v2632_v3  ;;  %v1154_v9 = vrot.slane %v2841_v40, 4  ;;  %v3003_v40 = vld [vmem:[%s3144_s1 + $0x1] ss:$0 sm:$0xff] }
 0x6dc   : > { %2377 = vmatprep.subr.bf16.mxu1 %v2632_v3 }
 0x6dd   : > { %v2362_v41 = vpop.f32.mrf.mxu1 }
 0x6e3   : > { %2378 = vmatpush3.bf16.xpose.msra.mxu1 %v2787_v11 }
 0x6e4   : > { %2379 = vmatprep.subr.bf16.mxu1 %v2632_v3 }
 0x6eb   : > { %2380 = vmatpush3.bf16.xpose.msra.mxu1 %v2793_v13 }
 0x6ec   : > { %2381 = vmatprep.subr.bf16.mxu1 %v2632_v3 }
 0x6f3   : > { %2382 = vmatpush3.bf16.xpose.msra.mxu1 %v2799_v15 }
 0x6f4   : > { %2383 = vmatprep.subr.bf16.mxu1 %v2632_v3 }
 0x6fb   : > { %2384 = vmatpush3.bf16.xpose.msra.mxu1 %v2805_v17 }
 0x6fc   : > { %2385 = vmatprep.subr.bf16.mxu1 %v2632_v3 }
 0x703   : > { %2386 = vmatpush3.bf16.xpose.msra.mxu1 %v2814_v19 }
 0x704   : > { %2387 = vmatprep.subr.bf16.mxu1 %v2632_v3 }
 0x70b   : > { %2388 = vmatpush3.bf16.xpose.msra.mxu1 %v2820_v21 }
 0x70c   : > { %2389 = vmatprep.subr.bf16.mxu1 %v2632_v3 }
 0x713   : > { %2390 = vmatpush3.bf16.xpose.msra.mxu1 %v2829_v23 }
 0x714   : > { %2427 = vmatprep.subr.bf16.mxu1 %v2632_v3 }
 0x71a   : > { %2392 = vmatmul.mubr.msk.bf16.vlgmr.msra.gmra.mxu1 %vm663_vm2, %v1154_v9 }
 0x71b   : > { %2429 = vmatprep.mubr.msk.bf16.mxu1 %vm2633_vm1, %v2632_v3 }
 0x79a   : > { %v2997_v11 = vpop.f32.mrf.mxu1 }
 0x79b   : > { %v1144_v37 = vadd.f32 %v2946_v56, %v2997_v11 }
 0x79c   : > { %v2367_v13 = vpop.f32.mrf.mxu1 }
 0x79e   : > { %v1097_v15 = vpop.f32.mrf.mxu1 }
 0x7a0   : > { %v2368_v17 = vpop.f32.mrf.mxu1 }
 0x7da   : > { %v1192_v19 = vpop.f32.mrf.mxu1 }
 0x7db   : > { %1200 = vrot.lane.b32.xlu0 %v1192_v19, %s2635_s16 }
 0x7dc   : > { %v2393_v21 = vpop.f32.mrf.mxu1 }
 0x7de   : > { %v1195_v42 = vpop.f32.mrf.mxu1 }
 0x7e0   : > { %v2394_v23 = vpop.f32.mrf.mxu1 }
 0x84d   : > { %v1201_v43 = vpop.permute.xlu0 %1200 }
 0x84e   : > { %v1247_v44 = vadd.f32 %v1246_v18, %v1201_v43 }
 0x850   : > { %v1252_v45 = vadd.f32 %v3003_v40, %v1247_v44 }
 0x852   : > { %v1253_v46 = vsel %vm785_vm5, %v1252_v45, -inf }
 0x853   : > { %1254 = vmax.xlane.f32.xlu1 %v1253_v46 }
 0x864   : > { %1314 = vrot.lane.b32.xlu1 %v1154_v9, %s2637_s23  ;;  %v1561_v9 = vadd.f32 %v1144_v37, %v2760_v5 }
 0x868   : > { %1365 = vrot.lane.b32.xlu1 %v2954_v2, %s2638_s11 }
 0x8dc   : > { %v1255_v47 = vpop.xlane.xlu1 %1254 }
 0x8dd   : > { %v1256_v48 = vsub.f32 %v1252_v45, %v1255_v47 }
 0x8df   : > { %v1257_v49 = vmul.f32 1.442695, %v1256_v48 }
 0x8e0   : > { %v1315_v51 = vpop.permute.xlu1 %1314 }
 0x8e1   : > { %2560 = vpow2.f32 %v1257_v49 }
 0x8e4   : > { %v1366_v52 = vpop.permute.xlu1 %1365 }
 0x8e5   : > { %v1371_v53 = vsel %vm663_vm2, %v1366_v52, 0 }
 0x8e6   : > { %2428 = vmatpush3.bf16.xpose.msra.mxu1 %v1371_v53 }
 0x8e7   : > { %2433 = vmatprep.subr.bf16.mxu1 %v2632_v3 }
 0x8ee   : > { %v2561_v54 = vpop.eup %2560 }
 0x8ef   : > { %v1259_v55 = vsel %vm785_vm5, %v2561_v54, 0.0 }
 0x8f0   : > { %1260 = vadd.xlane.f32.xlu0 %v1259_v55 }
 0x906   : > { %1265 = vrot.lane.b32.xlu0 %v2954_v2, %s2636_s17 }
 0x90a   : > { %1363 = vrot.lane.b32.xlu0 %v1202_v12, %s2637_s23 }
 0x979   : > { %v1261_v57 = vpop.xlane.xlu0 %1260 }
 0x97a   : > { %2562 = vrcp.f32 %v1261_v57 }
 0x97d   : > { %v1266_v58 = vpop.permute.xlu0 %1265 }
 0x97e   : > { %v1271_v59 = vsel %vm803_vm4, %v1266_v58, 0 }
 0x97f   : > { %2402 = vmatpush3.bf16.msra.mxu0 %v1271_v59  ;;  %v2546_v59 = vld [vmem:[%s2737_s12 + $0x8] sm:$0xff]  }
 0x980   : > { %2407 = vmatprep.subr.bf16.mxu0 %v2632_v3 }
 0x981   : > { %v1364_v60 = vpop.permute.xlu0 %1363 }
 0x982   : > { %2430 = vmatmul.mubr.msk.bf16.vlgmr.msra.gmra.mxu1 %vm663_vm2, %v1364_v60 }
 0x983   : > { %2435 = vmatprep.mubr.msk.bf16.mxu1 %vm2633_vm1, %v2632_v3 }
 0x987   : > { %v2563_v61 = vpop.eup %2562 }
 0x988   : > { %v1263_v62 = vmul.f32 %v2563_v61, %v2561_v54 }
 0x98a   : > { %v1264_v63 = vpack.c.bf16 %v1263_v62, %v1263_v62 }
 0x98c   : > { %2404 = vmatmul.mubr.msk.bf16.vlgmr.msra.gmra.mxu0 %vm785_vm5, %v1264_v63 }
 0x98d   : > { %2408 = vmatpush3.bf16.xpose.msra.mxu0 %v2885_v20  ;;  %2423 = vmatprep.mubr.msk.bf16.mxu0 %vm2633_vm1, %v2632_v3 }
 0x98e   : > { %2409 = vmatprep.subr.bf16.mxu0 %v2632_v3 }
 0x995   : > { %2410 = vmatpush3.bf16.xpose.msra.mxu0 %v2895_v27 }
 0x996   : > { %2411 = vmatprep.subr.bf16.mxu0 %v2632_v3 }
 0x99d   : > { %2412 = vmatpush3.bf16.xpose.msra.mxu0 %v2903_v28 }
 0x99e   : > { %2413 = vmatprep.subr.bf16.mxu0 %v2632_v3 }
 0x9a5   : > { %2414 = vmatpush3.bf16.xpose.msra.mxu0 %v2908_v29 }
 0x9a6   : > { %2415 = vmatprep.subr.bf16.mxu0 %v2632_v3 }
 0x9ad   : > { %2416 = vmatpush3.bf16.xpose.msra.mxu0 %v2913_v30 }
 0x9ae   : > { %2417 = vmatprep.subr.bf16.mxu0 %v2632_v3 }
 0x9b5   : > { %2418 = vmatpush3.bf16.xpose.msra.mxu0 %v2918_v31 }
 0x9b6   : > { %2419 = vmatprep.subr.bf16.mxu0 %v2632_v3 }
 0x9bd   : > { %2420 = vmatpush3.bf16.xpose.msra.mxu0 %v2923_v32 }
 0x9be   : > { %2421 = vmatprep.subr.bf16.mxu0 %v2632_v3 }
 0x9c5   : > { %2422 = vmatpush3.bf16.xpose.msra.mxu0 %v2928_v34 }
 0x9c6   : > { %2445 = vmatprep.subr.bf16.mxu0 %v2632_v3 }
 0x9cc   : > { %2424 = vmatmul.mubr.msk.bf16.vlgmr.msra.gmra.mxu0 %vm663_vm2, %v1315_v51 }
 0x9cd   : > { %2446 = vmatpush3.bf16.msra.mxu0 %v2933_v35  ;;  %2447 = vmatprep.mubr.msk.bf16.mxu0 %vm2633_vm1, %v2632_v3 }
 0x9ce   : > { %2459 = vmatprep.subr.bf16.mxu0 %v2632_v3 }
 0xa42   : > { %v1407_v39 = vpop.f32.mrf.mxu1 }
 0xa44   : > { %v2431_v20 = vpop.f32.mrf.mxu1 }
 0xa46   : > { %v1410_v27 = vpop.f32.mrf.mxu1 }
 0xa48   : > { %v2432_v28 = vpop.f32.mrf.mxu1 }
 0xa4c   : > { %v1307_v29 = vpop.f32.mrf.mxu0 }
 0xa4d   : > { %v1313_v30 = vpack.c.bf16 %v1307_v29, %v1307_v29  ;;  %v2184_v29 = vld [vmem:[%s2747_s25 + $0x2] ss:$0 sm:$0xff] }
 0xa4e   : > { %v2405_v31 = vpop.f32.mrf.mxu0 }
 0xa4f   : > { %2448 = vmatmul.mubr.msk.bf16.vlgmr.msra.gmra.mxu0 %vm663_vm2, %v1313_v30 }
 0xa50   : > { %v1310_v32 = vpop.f32.mrf.mxu0  ;;  %2467 = vmatprep.mubr.msk.bf16.mxu0 %vm2633_vm1, %v2632_v3 }
 0xa52   : > { %v2406_v34 = vpop.f32.mrf.mxu0 }
 0xa53   : > { %v2185_v34 = vld [vmem:[%s2747_s25 + $0x3] ss:$0 sm:$0xff] }
 0xa8c   : > { %v1353_v35 = vpop.f32.mrf.mxu0 }
 0xa8d   : > { %1361 = vrot.lane.b32.xlu1 %v1353_v35, %s2635_s16 }
 0xa8e   : > { %v2425_v0 = vpop.f32.mrf.mxu0 }
 0xa90   : > { %v1356_v50 = vpop.f32.mrf.mxu0 }
 0xa92   : > { %v2426_v1 = vpop.f32.mrf.mxu0 }
 0xaff   : > { %v1362_v4 = vpop.permute.xlu1 %1361 }
 0xb00   : > { %v1408_v8 = vadd.f32 %v1407_v39, %v1362_v4  ;;  %v2548_v4 = vld [vmem:[%s2742_s19 + $0x18] sm:$0xff]  }
 0xb01   : > { %2460 = vmatpush3.bf16.msra.mxu0 %v2548_v4 }
 0xb02   : > { %v1413_v10 = vadd.f32 %v3003_v40, %v1408_v8  ;;  %2461 = vmatprep.subr.bf16.mxu0 %v2632_v3  ;;  %v2549_v8 = vld [vmem:[%s2742_s19 + $0x10] sm:$0xff]  }
 0xb04   : > { %v1414_v12 = vsel %vm785_vm5, %v1413_v10, -inf }
 0xb05   : > { %1415 = vmax.xlane.f32.xlu0 %v1414_v12  ;;  %2462 = vmatpush3.bf16.msra.mxu0 %v2549_v8  ;;  %v2551_v12 = vld [vmem:[%s2742_s19] sm:$0xff]  }
 0xb06   : > { %2463 = vmatprep.subr.bf16.mxu0 %v2632_v3 }
 0xb0f   : > { %v1555_v33 = vpop.f32.mrf.mxu0 }
 0xb11   : > { %v2449_v7 = vpop.f32.mrf.mxu0 }
 0xb13   : > { %v1558_v14 = vpop.f32.mrf.mxu0 }
 0xb15   : > { %v2450_v18 = vpop.f32.mrf.mxu0 }
 0xb1b   : > { %1426 = vrot.lane.b32.xlu0 %v2954_v2, %s2639_s21  ;;  %v1563_v2 = vsel %vm534_vm3, %v1561_v9, 0.0 }
 0xb8e   : > { %v1416_v22 = vpop.xlane.xlu0 %1415 }
 0xb8f   : > { %v1417_v24 = vsub.f32 %v1413_v10, %v1416_v22  ;;  %v2550_v10 = vld [vmem:[%s2742_s19 + $0x8] sm:$0xff]  }
 0xb90   : > { %2464 = vmatpush3.bf16.msra.mxu0 %v2550_v10 }
 0xb91   : > { %v1418_v25 = vmul.f32 1.442695, %v1417_v24  ;;  %2465 = vmatprep.subr.bf16.mxu0 %v2632_v3 }
 0xb92   : > { %v1427_v26 = vpop.permute.xlu0 %1426 }
 0xb93   : > { %2564 = vpow2.f32 %v1418_v25  ;;  %v1432_v36 = vsel %vm803_vm4, %v1427_v26, 0 }
 0xb94   : > { %2434 = vmatpush3.bf16.msra.mxu1 %v1432_v36  ;;  %2466 = vmatpush3.bf16.msra.mxu0 %v2551_v12 }
 0xb95   : > { %2439 = vmatprep.subr.bf16.mxu1 %v2632_v3 }
 0xba0   : > { %v2565_v38 = vpop.eup %2564 }
 0xba1   : > { %v1420_v41 = vsel %vm785_vm5, %v2565_v38, 0.0 }
 0xba2   : > { %1421 = vadd.xlane.f32.xlu1 %v1420_v41 }
 0xba6   : > { %1564 = vadd.xlane.f32.xlu1 %v1563_v2 }
 0xc2b   : > { %v1422_v13 = vpop.xlane.xlu1 %1421 }
 0xc2c   : > { %2566 = vrcp.f32 %v1422_v13 }
 0xc2f   : > { %v1565_v23 = vpop.xlane.xlu1 %1564 }
 0xc30   : > { %v1570_v43 = vmul.f32 0.03125, %v1565_v23 }
 0xc32   : > { %v1572_v44 = vsub.f32 %v1561_v9, %v1570_v43 }
 0xc34   : > { %v1574_v49 = vmul.f32 %v1572_v44, %v1572_v44 }
 0xc36   : > { %v1576_v52 = vsel %vm534_vm3, %v1574_v49, 0.0 }
 0xc39   : > { %v2567_v15 = vpop.eup %2566 }
 0xc3a   : > { %v1424_v17 = vmul.f32 %v2567_v15, %v2565_v38 }
 0xc3c   : > { %v1425_v19 = vpack.c.bf16 %v1424_v17, %v1424_v17 }
 0xc3e   : > { %2436 = vmatmul.mubr.msk.bf16.vlgmr.msra.gmra.mxu1 %vm785_vm5, %v1425_v19 }
 0xc3f   : > { %2440 = vmatpush3.bf16.msra.mxu1 %v2970_v16  ;;  %2441 = vmatprep.mubr.msk.bf16.mxu1 %vm2633_vm1, %v2632_v3 }
 0xc40   : > { %2451 = vmatprep.subr.bf16.mxu1 %v2632_v3 }
 0xcfe   : > { %v1468_v56 = vpop.f32.mrf.mxu1 }
 0xcff   : > { %v1474_v5 = vpack.c.bf16 %v1468_v56, %v1468_v56 }
 0xd00   : > { %v2437_v11 = vpop.f32.mrf.mxu1 }
 0xd01   : > { %2442 = vmatmul.mubr.msk.bf16.vlgmr.msra.gmra.mxu1 %vm663_vm2, %v1474_v5 }
 0xd02   : > { %v1471_v21 = vpop.f32.mrf.mxu1  ;;  %2455 = vmatprep.mubr.msk.bf16.mxu1 %vm2633_vm1, %v2632_v3  ;;  %2452 = vmatpush3.bf16.msra.mxu1 %v2546_v59 }
 0xd03   : > { %2453 = vmatprep.subr.bf16.mxu1 %v2632_v3 }
 0xd04   : > { %v2438_v42 = vpop.f32.mrf.mxu1 }
 0xdc1   : > { %v1512_v40 = vpop.f32.mrf.mxu1 }
 0xdc2   : > { %v1556_v16 = vadd.f32 %v1555_v33, %v1512_v40  ;;  %v2186_v33 = vld [vmem:[%s2747_s25 + $0x4] ss:$0 sm:$0xff]  ;;  %v2190_v40 = vld [vmem:[%s2747_s25 + $0x5] ss:$0 sm:$0xff] }
 0xdc3   : > { %v2443_v45 = vpop.f32.mrf.mxu1 }
 0xdc4   : > { %v1562_v46 = vadd.f32 %v1556_v16, %v2762_v6  ;;  %v2547_v6 = vld [vmem:[%s2737_s12] sm:$0xff]  }
 0xdc5   : > { %v1515_v47 = vpop.f32.mrf.mxu1  ;;  %2454 = vmatpush3.bf16.msra.mxu1 %v2547_v6 }
 0xdc6   : > { %v1566_v48 = vsel %vm534_vm3, %v1562_v46, 0.0 }
 0xdc7   : > { %v2444_v51 = vpop.f32.mrf.mxu1  ;;  %1567 = vadd.xlane.f32.xlu1 %v1566_v48 }
 0xdcb   : > { %1577 = vadd.xlane.f32.xlu1 %v1576_v52 }
 0xe50   : > { %v1568_v53 = vpop.xlane.xlu1 %1567 }
 0xe51   : > { %v1571_v54 = vmul.f32 0.03125, %v1568_v53 }
 0xe53   : > { %v1573_v55 = vsub.f32 %v1562_v46, %v1571_v54 }
 0xe54   : > { %v1578_v60 = vpop.xlane.xlu1 %1577 }
 0xe55   : > { %v1575_v57 = vmul.f32 %v1573_v55, %v1573_v55  ;;  %v1582_v61 = vmul.f32 0.03125, %v1578_v60 }
 0xe57   : > { %v1579_v58 = vsel %vm534_vm3, %v1575_v57, 0.0  ;;  %v1584_v62 = vadd.f32 1e-12, %v1582_v61 }
 0xe58   : > { %1580 = vadd.xlane.f32.xlu1 %v1579_v58 }
 0xe59   : > { %2568 = vrsqrt.f32 %v1584_v62 }
 0xe66   : > { %v2569_v27 = vpop.eup %2568 }
 0xe67   : > { %v1588_v28 = vmul.f32 %v2569_v27, %v1572_v44 }
 0xe69   : > { %v1594_v32 = vmul.f32 %v2184_v29, %v1588_v28 }
 0xe6b   : > { %v1600_v0 = vadd.f32 %v2185_v34, %v1594_v32  ;;  %v2196_v32 = vld [vmem:[%s2747_s25 + $0x6] ss:$0 sm:$0xff] }
 0xee1   : > { %v1581_v63 = vpop.xlane.xlu1 %1580 }
 0xee2   : > { %v1583_v39 = vmul.f32 0.03125, %v1581_v63 }
 0xee4   : > { %v1585_v20 = vadd.f32 1e-12, %v1583_v39 }
 0xee6   : > { %2570 = vrsqrt.f32 %v1585_v20 }
 0xef3   : > { %v2571_v30 = vpop.eup %2570 }
 0xef4   : > { %v1589_v31 = vmul.f32 %v2571_v30, %v1573_v55 }
 0xef6   : > { %v1595_v35 = vmul.f32 %v2184_v29, %v1589_v31 }
 0xef8   : > { %v1601_v50 = vadd.f32 %v2185_v34, %v1595_v35  ;;  %v2197_v35 = vld [vmem:[%s2747_s25 + $0x7] ss:$0 sm:$0xff] }
 0xefa   : > { %v1602_v1 = vpack.c.bf16 %v1601_v50, %v1600_v0 }
 0xefc   : > { %2456 = vmatmul.mubr.msk.bf16.vlgmr.msra.gmra.mxu1 %vm534_vm3, %v1602_v1 }
 0xfbc   : > { %v1660_v7 = vpop.f32.mrf.mxu1 }
 0xfbd   : > { %v1661_v14 = vadd.f32 %v2186_v33, %v1660_v7 }
 0xfbe   : > { %v2457_v18 = vpop.f32.mrf.mxu1 }
 0xfbf   : > { %v1667_v22 = vmul.f32 %v1661_v14, %v1661_v14 }
 0xfc0   : > { %v1663_v24 = vpop.f32.mrf.mxu1 }
 0xfc1   : > { %v1669_v25 = vmul.f32 %v1667_v22, %v1661_v14  ;;  %v1664_v26 = vadd.f32 %v2186_v33, %v1663_v24 }
 0xfc2   : > { %v2458_v36 = vpop.f32.mrf.mxu1 }
 0xfc3   : > { %v1671_v37 = vmul.f32 0.044715, %v1669_v25  ;;  %v1668_v38 = vmul.f32 %v1664_v26, %v1664_v26 }
 0xfc5   : > { %v1673_v41 = vadd.f32 %v1671_v37, %v1661_v14  ;;  %v1670_v9 = vmul.f32 %v1668_v38, %v1664_v26 }
 0xfc7   : > { %v1675_v2 = vmul.f32 0.7978846, %v1673_v41  ;;  %v1672_v13 = vmul.f32 0.044715, %v1670_v9 }
 0xfc9   : > { %2572 = vtanh.f32 %v1675_v2  ;;  %v1674_v3 = vadd.f32 %v1672_v13, %v1664_v26 }
 0xfcb   : > { %v1676_v15 = vmul.f32 0.7978846, %v1674_v3 }
 0xfcd   : > { %2574 = vtanh.f32 %v1676_v15 }
 0xfd6   : > { %v2573_v17 = vpop.eup %2572 }
 0xfd7   : > { %v1679_v19 = vadd.f32 1.0, %v2573_v17 }
 0xfd9   : > { %v1681_v5 = vmul.f32 0.5, %v1679_v19 }
 0xfda   : > { %v2575_v56 = vpop.eup %2574 }
 0xfdb   : > { %v1680_v11 = vadd.f32 1.0, %v2575_v56  ;;  %v1683_v42 = vmul.f32 %v1681_v5, %v1661_v14 }
 0xfdd   : > { %v1682_v21 = vmul.f32 0.5, %v1680_v11 }
 0xfdf   : > { %v1684_v23 = vmul.f32 %v1682_v21, %v1664_v26 }
 0xfe1   : > { %v1685_v43 = vpack.c.bf16 %v1684_v23, %v1683_v42 }
 0xfe3   : > { %2468 = vmatmul.mubr.msk.bf16.vlgmr.msra.gmra.mxu0 %vm1722_vm6, %v1685_v43 }
0x10a3   : > { %v1760_v44 = vpop.f32.mrf.mxu0 }
0x10a4   : > { %v1761_v16 = vadd.f32 %v2190_v40, %v1760_v44 }
0x10a5   : > { %v2469_v45 = vpop.f32.mrf.mxu0 }
0x10a6   : > { %v1767_v46 = vadd.f32 %v1761_v16, %v1600_v0 }
0x10a7   : > { %v1763_v47 = vpop.f32.mrf.mxu0 }
0x10a8   : > { %v1764_v48 = vadd.f32 %v2190_v40, %v1763_v47  ;;  %v1769_v49 = vsel %vm534_vm3, %v1767_v46, 0.0 }
0x10a9   : > { %1770 = vadd.xlane.f32.xlu0 %v1769_v49  ;;  %v2470_v51 = vpop.f32.mrf.mxu0 }
0x10aa   : > { %v1768_v52 = vadd.f32 %v1764_v48, %v1601_v50 }
0x10ac   : > { %v1772_v53 = vsel %vm534_vm3, %v1768_v52, 0.0 }
0x10ad   : > { %1773 = vadd.xlane.f32.xlu1 %v1772_v53 }
0x1132   : > { %v1771_v54 = vpop.xlane.xlu0 %1770 }
0x1133   : > { %v1775_v55 = vmul.f32 0.03125, %v1771_v54 }
0x1135   : > { %v1777_v57 = vsub.f32 %v1767_v46, %v1775_v55 }
0x1136   : > { %v1774_v58 = vpop.xlane.xlu1 %1773 }
0x1137   : > { %v1776_v59 = vmul.f32 0.03125, %v1774_v58  ;;  %v1779_v6 = vmul.f32 %v1777_v57, %v1777_v57 }
0x1139   : > { %v1778_v60 = vsub.f32 %v1768_v52, %v1776_v59  ;;  %v1781_v61 = vsel %vm534_vm3, %v1779_v6, 0.0 }
0x113a   : > { %1782 = vadd.xlane.f32.xlu1 %v1781_v61 }
0x113b   : > { %v1780_v62 = vmul.f32 %v1778_v60, %v1778_v60 }
0x113d   : > { %v1784_v63 = vsel %vm534_vm3, %v1780_v62, 0.0 }
0x113e   : > { %1785 = vadd.xlane.f32.xlu1 %v1784_v63 }
0x11c3   : > { %v1783_v39 = vpop.xlane.xlu1 %1782 }
0x11c4   : > { %v1787_v20 = vmul.f32 0.03125, %v1783_v39 }
0x11c6   : > { %v1789_v27 = vadd.f32 1e-12, %v1787_v20 }
0x11c7   : > { %v1786_v28 = vpop.xlane.xlu1 %1785 }
0x11c8   : > { %2576 = vrsqrt.f32 %v1789_v27  ;;  %v1788_v29 = vmul.f32 0.03125, %v1786_v28 }
0x11ca   : > { %v1790_v30 = vadd.f32 1e-12, %v1788_v29 }
0x11cc   : > { %2578 = vrsqrt.f32 %v1790_v30 }
0x11d5   : > { %v2577_v31 = vpop.eup %2576 }
0x11d6   : > { %v1793_v34 = vmul.f32 %v2577_v31, %v1777_v57 }
0x11d8   : > { %v1799_v0 = vmul.f32 %v2196_v32, %v1793_v34 }
0x11d9   : > { %v2579_v50 = vpop.eup %2578 }
0x11da   : > { %v1805_v1 = vadd.f32 %v2197_v35, %v1799_v0  ;;  %v1794_v4 = vmul.f32 %v2579_v50, %v1778_v60 }
0x11dc   : > { %1807 = vst.msk [vmem:[#allocation2] sm:$0xff] %vm534_vm3, %v1805_v1  ;;  %v1800_v8 = vmul.f32 %v2196_v32, %v1794_v4  ;;  %1812 = sbr.rel (%p2198_p6) target bundleno = 4788 (0x12b4), region = 68 }
0x11de   : > { %v1806_v10 = vadd.f32 %v2197_v35, %v1800_v8 }
0x11e0   : > { %1808 = vst.msk [vmem:[#allocation2 + $0x8] sm:$0xff] %vm534_vm3, %v1806_v10 }
0x11e1   : > { %v1816_v12 = vld [vmem:[%s3151_s8 + $0x18] sm:$0xff]  ;;  %v1818_v33 = vsel %vm534_vm3, %v1805_v1, 0.0  ;;  %v2640_v7 = vmov 0.0   ;;  %v1815_v14 = vld [vmem:[%s3151_s8 + $0x10] sm:$0xff]  ;;  %v1902_v22 = vsel %vm534_vm3, %v1806_v10, 0.0  ;;  %v1814_v25 = vld [vmem:[%s3151_s8 + $0x8] sm:$0xff] }
0x11e2   : > { %2471 = vmatprep.subr.mxu0 %v2640_v7  ;;  %2482 = vmatprep.subr.mxu1 %v2640_v7  ;;  %v1819_v18 = vrot.slane %v1818_v33, 4  ;;  %v1903_v24 = vrot.slane %v1902_v22, 4  ;;  %v1813_v37 = vld [vmem:[%s3151_s8] sm:$0xff]  ;;  %vm2641_vm7 = vmmov 0   ;;  %vm1900_vm8 = vcmask 57344  }
0x11e3   : > { %2472 = vmatpush3.msra.mxu0 %v1816_v12  ;;  %2483 = vmatpush3.msra.mxu1 %v1816_v12  ;;  %v1817_v5 = vld [vmem:[%s3152_s9] sm:$0x1] }
0x11e4   : > { %2473 = vmatprep.subr.mxu0 %v2640_v7  ;;  %2484 = vmatprep.subr.mxu1 %v2640_v7  ;;  %v1820_v26 = vadd.f32 %v1819_v18, %v1818_v33  ;;  %v1904_v36 = vadd.f32 %v1903_v24, %v1902_v22 }
0x11e5   : > { %2474 = vmatpush3.msra.mxu0 %v1815_v14  ;;  %2485 = vmatpush3.msra.mxu1 %v1815_v14 }
0x11e6   : > { %2475 = vmatprep.subr.mxu0 %v2640_v7  ;;  %2486 = vmatprep.subr.mxu1 %v2640_v7  ;;  %v1821_v38 = vrot.slane %v1820_v26, 2  ;;  %v1905_v41 = vrot.slane %v1904_v36, 2 }
0x11e7   : > { %2476 = vmatpush3.msra.mxu0 %v1814_v25  ;;  %2487 = vmatpush3.msra.mxu1 %v1814_v25 }
0x11e8   : > { %2477 = vmatprep.subr.mxu0 %v2640_v7  ;;  %2488 = vmatprep.subr.mxu1 %v2640_v7  ;;  %v1822_v9 = vadd.f32 %v1821_v38, %v1820_v26  ;;  %v1906_v2 = vadd.f32 %v1905_v41, %v1904_v36 }
0x11e9   : > { %2478 = vmatpush3.msra.mxu0 %v1813_v37  ;;  %2479 = vmatprep.mubr.msk.f32.mxu0 %vm2641_vm7, %v2640_v7 }
0x11ea   : > { %2489 = vmatpush3.msra.mxu1 %v1813_v37  ;;  %2490 = vmatprep.mubr.msk.f32.mxu1 %vm2641_vm7, %v2640_v7  ;;  %v1823_v13 = vrot.slane %v1822_v9, 1  ;;  %v1907_v3 = vrot.slane %v1906_v2, 1 }
0x11ec   : > { %v1824_v15 = vadd.f32 %v1823_v13, %v1822_v9  ;;  %v1908_v17 = vadd.f32 %v1907_v3, %v1906_v2 }
0x11ee   : > { %v1826_v19 = vmul.f32 0.125, %v1824_v15  ;;  %v1909_v56 = vmul.f32 0.125, %v1908_v17 }
0x11f0   : > { %2480 = vmatmul.mubr.msk.f32.vlgmr.msra.gmra.mxu0 %vm534_vm3, %v1826_v19  ;;  %2491 = vmatmul.mubr.msk.f32.vlgmr.msra.gmra.mxu1 %vm534_vm3, %v1909_v56 }
0x12b0   : > { %v1896_v11 = vpop.f32.mrf.mxu0  ;;  %v1979_v42 = vpop.f32.mrf.mxu1 }
0x12b1   : > { %v1897_v21 = vadd.f32 %v1896_v11, %v1817_v5  ;;  %v1980_v23 = vadd.f32 %v1979_v42, %v1817_v5 }
0x12b2   : > { %v2481_v43 = vpop.f32.mrf.mxu0  ;;  %v2492_v40 = vpop.f32.mrf.mxu1 }
0x12b3   : > { %1901 = vst.msk [vmem:[#allocation3] sm:$0x1] %vm1900_vm8, %v1897_v21  ;;  %1983 = vst.msk [vmem:[#allocation3 + $0x1] sm:$0x1] %vm1900_vm8, %v1980_v23 }
0x12b4 PF: > { %s3157_s16 = sadd.s32 4294967295, %s2630_s15   ;;  %s2642_s23 = smov [#allocation3]  }
0x12b5   : > { %p3119_p7 = scmp.eq.s32.totalorder %s3157_s16, 1  ;;  %s1993_s26 = sshll.u32 %s2642_s23, 4  ;;  %s1994_s26 = int_to_ptr.vmem [resolvable:$true] %s1993_s26 }
0x12b6   : > { %s2580_s30 = scalar_lea.vmem %s1994_s26, 32  ;;  %p2587_p11 = scmp.lt.s32.totalorder %s1994_s26, %s1994_s26 }
0x12b7   : > { %p2581_p8 = scmp.ne.s32.totalorder %s1994_s26, %s2580_s30  ;;  %p2588_p12 = scmp.lt.s32.totalorder %s2580_s30, %s2580_s30 }
0x12b9   : > { %p2582_p9 = pnand %p2581_p8, %p3119_p7  ;;  %p2589_p13 = por %p2588_p12, %p2587_p11 }
0x12bb   : > { %p2583_p10 = pneg %p2582_p9 }
0x12bd   : > { %p2590_p0 = pnand %p2589_p13, %p2583_p10 }
0x12bf   : > { %2593 = shalt.err (!%p2590_p0)
}
0x12c0   : > { %2494 = dma.vmem_to_hbm [thread:$0]  (%p3119_p7), %s1994_s26, 32, %s3153_s10, [#allocation4]  }
0x12c1   : > { %2617 = dma.done.wait (%p3119_p7), [#allocation4], 32  }
0x12c2   : > { %2619 = vsyncadd (%p3119_p7), [#allocation4], 4294967264 }
0x12c3 PF: > { %s21_s15 = sadd.s32 1, %s2630_s15   ;;  %s3159_s13 = sld [smem:[#allocation6_spill]] }
0x12c4   : > { %p18_p1 = scmp.ge.s32.totalorder %s21_s15, 4   ;;  %s3160_s14 = sld [smem:[#allocation7_spill]] }
0x12c6   :  { %20 = sbr.rel (!%p18_p1) target bundleno = 2 (0x2), region = 117 }
0x12cb   :  { %2006 = vsyncpa [#allocation4], 1 }
0x12cc   :  { %2008 = vsyncpa [#allocation4 + $0x1], 1 }

</bundles_post_ra>
